<compile_context>
chip_gen: v6e
topology: v6e:2x2x1
jax: 0.10.0
libtpu: 0.0.40
codegen_flags: <defaults>
</compile_context>

<pallas_src>
import functools
import math

import jax
import jax.numpy as jnp
from jax.experimental import pallas as pl
from jax.experimental.pallas import tpu as pltpu


# ---------------- Pallas kernels ----------------

def _gn_stats_kernel(x_ref, s1_ref, s2_ref):
    # x_ref block: (1, C, S) -- one batch element, channels x flattened spatial (full vreg sublanes)
    x = x_ref[0].astype(jnp.float32)                      # (C, S)
    s1_ref[0] = jnp.sum(x, axis=1, keepdims=True)         # (C, 1) per-channel sum
    s2_ref[0] = jnp.sum(x * x, axis=1, keepdims=True)     # (C, 1) per-channel sum of squares


def _fused_gn_swish_conv_kernel(xp_ref, scale_ref, shift_ref, mask_ref, w_ref, b_ref,
                                o_ref, yext_ref, col_ref, *, c_in, margin, sp, shifts):
    C = c_in
    # --- GroupNorm affine + Swish in f32; halo re-zeroed so the conv sees true zero padding ---
    x = xp_ref[0].astype(jnp.float32)                     # (C, Sp) zero-padded raw activation
    y = x * scale_ref[0] + shift_ref[0]                   # per-(n, c) scale/shift, (C, 1) broadcast
    y = y * jax.nn.sigmoid(y)                             # Swish
    y = y * mask_ref[...]                                 # (1, Sp): zero the padded halo again
    yb = y.astype(jnp.bfloat16)                           # bf16 MXU operand (f32 accumulate below)

    # --- margin-extended copy so every tap shift is an in-bounds static slice ---
    zeros_m = jnp.zeros((C, margin), jnp.bfloat16)
    yext_ref[:, :margin] = zeros_m
    yext_ref[:, margin + sp:] = zeros_m
    yext_ref[:, margin:margin + sp] = yb

    # --- im2col built in VMEM: 27 lane-shifted views stacked along the K dimension ---
    for k, s in enumerate(shifts):                        # static 27-iteration python loop
        col_ref[k * C:(k + 1) * C, :] = yext_ref[:, margin + s: margin + s + sp]

    # --- single MXU matmul with K = 27*C (instead of 27 tiny K=C dots) ---
    acc = jnp.dot(w_ref[...], col_ref[...], preferred_element_type=jnp.float32)   # (Cout, Sp) f32
    o_ref[0] = (acc + b_ref[...]).astype(o_ref.dtype)


# ---------------- Wrapper ----------------

def block_forward(x, gamma, beta, conv_w, conv_b, *, groups=4, eps=1e-5):
    N, C, D, H, W = x.shape
    Cout = conv_w.shape[0]
    G = groups
    Cg = C // G
    S = D * H * W
    Dp, Hp, Wp = D + 2, H + 2, W + 2
    Sp = Dp * Hp * Wp
    max_shift = Hp * Wp + Wp + 1                      # largest |tap offset| in flat padded coords
    margin = ((max_shift + 127) // 128) * 128         # 128-lane aligned shift margin

    # ---- Kernel 1: per-(n, c) sums (one read of x) ----
    x3 = x.reshape(N, C, S)
    s1, s2 = pl.pallas_call(
        _gn_stats_kernel,
        out_shape=(jax.ShapeDtypeStruct((N, C, 1), jnp.float32),
                   jax.ShapeDtypeStruct((N, C, 1), jnp.float32)),
        grid=(N,),
        in_specs=[pl.BlockSpec((1, C, S), lambda n: (n, 0, 0))],
        out_specs=(pl.BlockSpec((1, C, 1), lambda n: (n, 0, 0)),
                   pl.BlockSpec((1, C, 1), lambda n: (n, 0, 0))),
        compiler_params=pltpu.CompilerParams(dimension_semantics=("parallel",)),
    )(x3)

    # ---- Finish GroupNorm statistics on N*C scalars (negligible glue) ----
    cnt = Cg * S
    s1g = s1.reshape(N, G, Cg).sum(axis=2)
    s2g = s2.reshape(N, G, Cg).sum(axis=2)
    mean = s1g / cnt
    var = s2g / cnt - mean * mean                     # biased variance (matches PyTorch GroupNorm)
    rstd = jax.lax.rsqrt(var + eps)
    mean_c = jnp.repeat(mean, Cg, axis=1)             # (N, C)
    rstd_c = jnp.repeat(rstd, Cg, axis=1)
    scale = gamma[None, :] * rstd_c                   # y = x*scale + shift == gamma*(x-mean)*rstd + beta
    shift = beta[None, :] - mean_c * scale
    scale = scale.reshape(N, C, 1).astype(jnp.float32)
    shift = shift.reshape(N, C, 1).astype(jnp.float32)

    # ---- Kernel 2: fused normalize + Swish + Conv3d ----
    # Only the zero-padded RAW activation is materialized in HBM (~(Sp/S)x, not 27x im2col).
    xp = jnp.pad(x, ((0, 0), (0, 0), (1, 1), (1, 1), (1, 1))).reshape(N, C, Sp)
    mask = jnp.pad(jnp.ones((D, H, W), jnp.float32),
                   ((1, 1), (1, 1), (1, 1))).reshape(1, Sp)
    # fold the 27 taps into the matmul K dimension: (Cout, 27*C), column order = (kd, kh, kw, c)
    w2 = jnp.transpose(conv_w, (0, 2, 3, 4, 1)).reshape(Cout, 27 * C).astype(jnp.bfloat16)
    b2 = conv_b.reshape(Cout, 1).astype(jnp.float32)
    shifts = tuple(dd * Hp * Wp + dh * Wp + dw
                   for dd in (-1, 0, 1) for dh in (-1, 0, 1) for dw in (-1, 0, 1))

    # TODO(synk): for production spatial sizes add a depth/spatial grid axis with halo handling
    # (manual make_async_copy / emit_pipeline) so per-step VMEM stays bounded on v7x (64 MiB).
    out_p = pl.pallas_call(
        functools.partial(_fused_gn_swish_conv_kernel,
                          c_in=C, margin=margin, sp=Sp, shifts=shifts),
        out_shape=jax.ShapeDtypeStruct((N, Cout, Sp), x.dtype),
        grid=(N,),
        in_specs=[pl.BlockSpec((1, C, Sp), lambda n: (n, 0, 0)),   # padded raw activation
                  pl.BlockSpec((1, C, 1), lambda n: (n, 0, 0)),    # per-(n, c) scale
                  pl.BlockSpec((1, C, 1), lambda n: (n, 0, 0)),    # per-(n, c) shift
                  pl.BlockSpec((1, Sp), lambda n: (0, 0)),         # interior mask (shared)
                  pl.BlockSpec((Cout, 27 * C), lambda n: (0, 0)),  # folded weights, K = 27*C
                  pl.BlockSpec((Cout, 1), lambda n: (0, 0))],      # bias
        out_specs=pl.BlockSpec((1, Cout, Sp), lambda n: (n, 0, 0)),
        scratch_shapes=[pltpu.VMEM((C, margin + Sp + margin), jnp.bfloat16),  # margin-extended act
                        pltpu.VMEM((27 * C, Sp), jnp.bfloat16)],              # VMEM im2col
        compiler_params=pltpu.CompilerParams(
            dimension_semantics=("parallel",),
            vmem_limit_bytes=48 * 1024 * 1024),
    )(xp, scale, shift, mask, w2, b2)

    # drop the halo output columns and restore NCDHW
    out = out_p.reshape(N, Cout, Dp, Hp, Wp)[:, :, 1:1 + D, 1:1 + H, 1:1 + W]
    return out


# ---------------- Pure-JAX reference (for verification only) ----------------

def _reference(x, gamma, beta, conv_w, conv_b, groups, eps=1e-5):
    N, C, D, H, W = x.shape
    xr = x.reshape(N, groups, -1)
    mean = xr.mean(axis=2, keepdims=True)
    var = ((xr - mean) ** 2).mean(axis=2, keepdims=True)
    xn = ((xr - mean) / jnp.sqrt(var + eps)).reshape(N, C, D, H, W)
    y = xn * gamma.reshape(1, C, 1, 1, 1) + beta.reshape(1, C, 1, 1, 1)
    y = y * jax.nn.sigmoid(y)
    out = jax.lax.conv_general_dilated(
        y, conv_w, window_strides=(1, 1, 1), padding=((1, 1), (1, 1), (1, 1)),
        dimension_numbers=("NCDHW", "OIDHW", "NCDHW"),
        precision=jax.lax.Precision.HIGHEST)
    return out + conv_b.reshape(1, -1, 1, 1, 1)


if __name__ == "__main__":
    N, C, Cout, D, H, W, G = 2, 8, 8, 8, 8, 8, 4

    key = jax.random.PRNGKey(0)
    k1, k2, k3, k4, k5 = jax.random.split(key, 5)

    x = jax.random.normal(k1, (N, C, D, H, W), jnp.float32)

    # GroupNorm affine params (deterministic, slightly perturbed from PyTorch defaults)
    gamma = 1.0 + 0.1 * jax.random.normal(k2, (C,), jnp.float32)
    beta = 0.1 * jax.random.normal(k3, (C,), jnp.float32)

    # Conv3d params, PyTorch-style uniform init bound = 1/sqrt(fan_in)
    fan_in = C * 3 * 3 * 3
    bound = 1.0 / math.sqrt(fan_in)
    conv_w = jax.random.uniform(k4, (Cout, C, 3, 3, 3), jnp.float32, -bound, bound)
    conv_b = jax.random.uniform(k5, (Cout,), jnp.float32, -bound, bound)

    fwd = jax.jit(functools.partial(block_forward, groups=G))
    out = fwd(x, gamma, beta, conv_w, conv_b)
    jax.block_until_ready(out)

    ref = _reference(x, gamma, beta, conv_w, conv_b, G)
    assert out.shape == ref.shape == (N, Cout, D, H, W)
    max_err = float(jnp.max(jnp.abs(out - ref)))
    # tolerance accounts for bf16 MXU operands (f32 accumulation); GN/Swish math is f32
    if max_err < 4e-2:
        print("KERNEL_OK")
    else:
        print(f"MISMATCH max_err={max_err}")
</pallas_src>

<mosaic_0001>
module attributes {stable_mosaic.version = 11 : i64} {
  func.func @_gn_stats_kernel(%arg0: i32, %arg1: memref<1x8x512xf32, #tpu.memory_space<vmem>>, %arg2: memref<1x8x1xf32, #tpu.memory_space<vmem>>, %arg3: memref<1x8x1xf32, #tpu.memory_space<vmem>>) attributes {dimension_semantics = [#tpu.dimension_semantics<parallel>], iteration_bounds = array<i64: 2>, scalar_prefetch = 0 : i64, scratch_operands = 0 : i64, tpu.core_type = #tpu.core_type<tc>, window_params = [{transform_indices = @transform_0, window_bounds = array<i64: 1, 8, 512>}, {transform_indices = @transform_1, window_bounds = array<i64: 1, 8, 1>}, {transform_indices = @transform_2, window_bounds = array<i64: 1, 8, 1>}]} {
    %c0 = arith.constant 0 : index
    %c0_0 = arith.constant 0 : index
    %c0_1 = arith.constant 0 : index
    %0 = vector.load %arg1[%c0, %c0_0, %c0_1] : memref<1x8x512xf32, #tpu.memory_space<vmem>>, vector<1x8x512xf32>
    %1 = vector.shape_cast %0 : vector<1x8x512xf32> to vector<8x512xf32>
    %cst = arith.constant dense<0.000000e+00> : vector<8xf32>
    %2 = vector.multi_reduction <add>, %1, %cst [1] : vector<8x512xf32> to vector<8xf32>
    %3 = vector.shape_cast %2 : vector<8xf32> to vector<8x1xf32>
    %c0_2 = arith.constant 0 : index
    %c0_3 = arith.constant 0 : index
    %c0_4 = arith.constant 0 : index
    %4 = vector.load %arg2[%c0_2, %c0_3, %c0_4] : memref<1x8x1xf32, #tpu.memory_space<vmem>>, vector<1x8x1xf32>
    %5 = vector.shape_cast %4 : vector<1x8x1xf32> to vector<8x1xf32>
    %6 = vector.shape_cast %3 : vector<8x1xf32> to vector<1x8x1xf32>
    tpu.vector_store %arg2[%c0_2, %c0_3, %c0_4], %6 {strides = array<i32>} : memref<1x8x1xf32, #tpu.memory_space<vmem>>, vector<1x8x1xf32>,
    %7 = arith.mulf %1, %1 : vector<8x512xf32>
    %cst_5 = arith.constant dense<0.000000e+00> : vector<8xf32>
    %8 = vector.multi_reduction <add>, %7, %cst_5 [1] : vector<8x512xf32> to vector<8xf32>
    %9 = vector.shape_cast %8 : vector<8xf32> to vector<8x1xf32>
    %c0_6 = arith.constant 0 : index
    %c0_7 = arith.constant 0 : index
    %c0_8 = arith.constant 0 : index
    %10 = vector.load %arg3[%c0_6, %c0_7, %c0_8] : memref<1x8x1xf32, #tpu.memory_space<vmem>>, vector<1x8x1xf32>
    %11 = vector.shape_cast %10 : vector<1x8x1xf32> to vector<8x1xf32>
    %12 = vector.shape_cast %9 : vector<8x1xf32> to vector<1x8x1xf32>
    tpu.vector_store %arg3[%c0_6, %c0_7, %c0_8], %12 {strides = array<i32>} : memref<1x8x1xf32, #tpu.memory_space<vmem>>, vector<1x8x1xf32>,
    return
  }
  func.func @transform_0(%arg0: i32) -> (i32, i32, i32) {
    %c0_i32 = arith.constant 0 : i32
    %c0_i32_0 = arith.constant 0 : i32
    %c0_i32_1 = arith.constant 0 : i32
    return %arg0, %c0_i32, %c0_i32_0 : i32, i32, i32
  }
  func.func @transform_1(%arg0: i32) -> (i32, i32, i32) {
    %c0_i32 = arith.constant 0 : i32
    %c0_i32_0 = arith.constant 0 : i32
    %c0_i32_1 = arith.constant 0 : i32
    return %arg0, %c0_i32, %c0_i32_0 : i32, i32, i32
  }
  func.func @transform_2(%arg0: i32) -> (i32, i32, i32) {
    %c0_i32 = arith.constant 0 : i32
    %c0_i32_0 = arith.constant 0 : i32
    %c0_i32_1 = arith.constant 0 : i32
    return %arg0, %c0_i32, %c0_i32_0 : i32, i32, i32
  }
}

module attributes {stable_mosaic.version = 11 : i64} {
  func.func @_fused_gn_swish_conv_kernel(%arg0: i32, %arg1: memref<1x8x1000xf32, #tpu.memory_space<vmem>>, %arg2: memref<1x8x1xf32, #tpu.memory_space<vmem>>, %arg3: memref<1x8x1xf32, #tpu.memory_space<vmem>>, %arg4: memref<1x1000xf32, #tpu.memory_space<vmem>>, %arg5: memref<8x216xbf16, #tpu.memory_space<vmem>>, %arg6: memref<8x1xf32, #tpu.memory_space<vmem>>, %arg7: memref<1x8x1000xf32, #tpu.memory_space<vmem>>, %arg8: memref<8x1256xbf16, #tpu.memory_space<vmem>>, %arg9: memref<216x1000xbf16, #tpu.memory_space<vmem>>) attributes {dimension_semantics = [#tpu.dimension_semantics<parallel>], iteration_bounds = array<i64: 2>, scalar_prefetch = 0 : i64, scratch_operands = 2 : i64, tpu.core_type = #tpu.core_type<tc>, window_params = [{transform_indices = @transform_0, window_bounds = array<i64: 1, 8, 1000>}, {transform_indices = @transform_1, window_bounds = array<i64: 1, 8, 1>}, {transform_indices = @transform_2, window_bounds = array<i64: 1, 8, 1>}, {pipeline_mode = #tpu.pipeline_mode<synchronous>, transform_indices = @transform_3, window_bounds = array<i64: 1, 1000>}, {pipeline_mode = #tpu.pipeline_mode<synchronous>, transform_indices = @transform_4, window_bounds = array<i64: 8, 216>}, {pipeline_mode = #tpu.pipeline_mode<synchronous>, transform_indices = @transform_5, window_bounds = array<i64: 8, 1>}, {transform_indices = @transform_6, window_bounds = array<i64: 1, 8, 1000>}]} {
    %c0 = arith.constant 0 : index
    %c0_0 = arith.constant 0 : index
    %c0_1 = arith.constant 0 : index
    %0 = vector.load %arg1[%c0, %c0_0, %c0_1] : memref<1x8x1000xf32, #tpu.memory_space<vmem>>, vector<1x8x1000xf32>
    %1 = vector.shape_cast %0 : vector<1x8x1000xf32> to vector<8x1000xf32>
    %c0_2 = arith.constant 0 : index
    %c0_3 = arith.constant 0 : index
    %c0_4 = arith.constant 0 : index
    %2 = vector.load %arg2[%c0_2, %c0_3, %c0_4] : memref<1x8x1xf32, #tpu.memory_space<vmem>>, vector<1x8x1xf32>
    %3 = vector.shape_cast %2 : vector<1x8x1xf32> to vector<8x1xf32>
    %4 = vector.broadcast %3 : vector<8x1xf32> to vector<8x1000xf32>
    %5 = arith.mulf %1, %4 : vector<8x1000xf32>
    %c0_5 = arith.constant 0 : index
    %c0_6 = arith.constant 0 : index
    %c0_7 = arith.constant 0 : index
    %6 = vector.load %arg3[%c0_5, %c0_6, %c0_7] : memref<1x8x1xf32, #tpu.memory_space<vmem>>, vector<1x8x1xf32>
    %7 = vector.shape_cast %6 : vector<1x8x1xf32> to vector<8x1xf32>
    %8 = vector.broadcast %7 : vector<8x1xf32> to vector<8x1000xf32>
    %9 = arith.addf %5, %8 : vector<8x1000xf32>
    %10 = arith.negf %9 : vector<8x1000xf32>
    %11 = math.exp %10 : vector<8x1000xf32>
    %cst = arith.constant 1.000000e+00 : f32
    %12 = vector.broadcast %cst : f32 to vector<8x1000xf32>
    %13 = arith.addf %12, %11 : vector<8x1000xf32>
    %14 = arith.divf %12, %13 : vector<8x1000xf32>
    %15 = arith.mulf %9, %14 : vector<8x1000xf32>
    %c0_8 = arith.constant 0 : index
    %c0_9 = arith.constant 0 : index
    %16 = vector.load %arg4[%c0_8, %c0_9] : memref<1x1000xf32, #tpu.memory_space<vmem>>, vector<1x1000xf32>
    %17 = vector.broadcast %16 : vector<1x1000xf32> to vector<8x1000xf32>
    %18 = arith.mulf %15, %17 : vector<8x1000xf32>
    %19 = arith.truncf %18 : vector<8x1000xf32> to vector<8x1000xbf16>
    %cst_10 = arith.constant 0.000000e+00 : bf16
    %20 = vector.broadcast %cst_10 : bf16 to vector<8x128xbf16>
    %c0_11 = arith.constant 0 : index
    %c0_12 = arith.constant 0 : index
    %21 = vector.load %arg8[%c0_11, %c0_12] : memref<8x1256xbf16, #tpu.memory_space<vmem>>, vector<8x128xbf16>
    tpu.vector_store %arg8[%c0_11, %c0_12], %20 {strides = array<i32>} : memref<8x1256xbf16, #tpu.memory_space<vmem>>, vector<8x128xbf16>,
    %c0_13 = arith.constant 0 : index
    %c1128 = arith.constant 1128 : index
    %22 = vector.load %arg8[%c0_13, %c1128] : memref<8x1256xbf16, #tpu.memory_space<vmem>>, vector<8x128xbf16>
    tpu.vector_store %arg8[%c0_13, %c1128], %20 {strides = array<i32>} : memref<8x1256xbf16, #tpu.memory_space<vmem>>, vector<8x128xbf16>,
    %c0_14 = arith.constant 0 : index
    %c128 = arith.constant 128 : index
    %23 = vector.load %arg8[%c0_14, %c128] : memref<8x1256xbf16, #tpu.memory_space<vmem>>, vector<8x1000xbf16>
    tpu.vector_store %arg8[%c0_14, %c128], %19 {strides = array<i32>} : memref<8x1256xbf16, #tpu.memory_space<vmem>>, vector<8x1000xbf16>,
    %c0_15 = arith.constant 0 : index
    %c17 = arith.constant 17 : index
    %24 = vector.load %arg8[%c0_15, %c17] : memref<8x1256xbf16, #tpu.memory_space<vmem>>, vector<8x1000xbf16>
    %c0_16 = arith.constant 0 : index
    %c0_17 = arith.constant 0 : index
    %25 = vector.load %arg9[%c0_16, %c0_17] : memref<216x1000xbf16, #tpu.memory_space<vmem>>, vector<8x1000xbf16>
    tpu.vector_store %arg9[%c0_16, %c0_17], %24 {strides = array<i32>} : memref<216x1000xbf16, #tpu.memory_space<vmem>>, vector<8x1000xbf16>,
    %c0_18 = arith.constant 0 : index
    %c18 = arith.constant 18 : index
    %26 = vector.load %arg8[%c0_18, %c18] : memref<8x1256xbf16, #tpu.memory_space<vmem>>, vector<8x1000xbf16>
    %c8 = arith.constant 8 : index
    %c0_19 = arith.constant 0 : index
    %27 = vector.load %arg9[%c8, %c0_19] : memref<216x1000xbf16, #tpu.memory_space<vmem>>, vector<8x1000xbf16>
    tpu.vector_store %arg9[%c8, %c0_19], %26 {strides = array<i32>} : memref<216x1000xbf16, #tpu.memory_space<vmem>>, vector<8x1000xbf16>,
    %c0_20 = arith.constant 0 : index
    %c19 = arith.constant 19 : index
    %28 = vector.load %arg8[%c0_20, %c19] : memref<8x1256xbf16, #tpu.memory_space<vmem>>, vector<8x1000xbf16>
    %c16 = arith.constant 16 : index
    %c0_21 = arith.constant 0 : index
    %29 = vector.load %arg9[%c16, %c0_21] : memref<216x1000xbf16, #tpu.memory_space<vmem>>, vector<8x1000xbf16>
    tpu.vector_store %arg9[%c16, %c0_21], %28 {strides = array<i32>} : memref<216x1000xbf16, #tpu.memory_space<vmem>>, vector<8x1000xbf16>,
    %c0_22 = arith.constant 0 : index
    %c27 = arith.constant 27 : index
    %30 = vector.load %arg8[%c0_22, %c27] : memref<8x1256xbf16, #tpu.memory_space<vmem>>, vector<8x1000xbf16>
    %c24 = arith.constant 24 : index
    %c0_23 = arith.constant 0 : index
    %31 = vector.load %arg9[%c24, %c0_23] : memref<216x1000xbf16, #tpu.memory_space<vmem>>, vector<8x1000xbf16>
    tpu.vector_store %arg9[%c24, %c0_23], %30 {strides = array<i32>} : memref<216x1000xbf16, #tpu.memory_space<vmem>>, vector<8x1000xbf16>,
    %c0_24 = arith.constant 0 : index
    %c28 = arith.constant 28 : index
    %32 = vector.load %arg8[%c0_24, %c28] : memref<8x1256xbf16, #tpu.memory_space<vmem>>, vector<8x1000xbf16>
    %c32 = arith.constant 32 : index
    %c0_25 = arith.constant 0 : index
    %33 = vector.load %arg9[%c32, %c0_25] : memref<216x1000xbf16, #tpu.memory_space<vmem>>, vector<8x1000xbf16>
    tpu.vector_store %arg9[%c32, %c0_25], %32 {strides = array<i32>} : memref<216x1000xbf16, #tpu.memory_space<vmem>>, vector<8x1000xbf16>,
    %c0_26 = arith.constant 0 : index
    %c29 = arith.constant 29 : index
    %34 = vector.load %arg8[%c0_26, %c29] : memref<8x1256xbf16, #tpu.memory_space<vmem>>, vector<8x1000xbf16>
    %c40 = arith.constant 40 : index
    %c0_27 = arith.constant 0 : index
    %35 = vector.load %arg9[%c40, %c0_27] : memref<216x1000xbf16, #tpu.memory_space<vmem>>, vector<8x1000xbf16>
    tpu.vector_store %arg9[%c40, %c0_27], %34 {strides = array<i32>} : memref<216x1000xbf16, #tpu.memory_space<vmem>>, vector<8x1000xbf16>,
    %c0_28 = arith.constant 0 : index
    %c37 = arith.constant 37 : index
    %36 = vector.load %arg8[%c0_28, %c37] : memref<8x1256xbf16, #tpu.memory_space<vmem>>, vector<8x1000xbf16>
    %c48 = arith.constant 48 : index
    %c0_29 = arith.constant 0 : index
    %37 = vector.load %arg9[%c48, %c0_29] : memref<216x1000xbf16, #tpu.memory_space<vmem>>, vector<8x1000xbf16>
    tpu.vector_store %arg9[%c48, %c0_29], %36 {strides = array<i32>} : memref<216x1000xbf16, #tpu.memory_space<vmem>>, vector<8x1000xbf16>,
    %c0_30 = arith.constant 0 : index
    %c38 = arith.constant 38 : index
    %38 = vector.load %arg8[%c0_30, %c38] : memref<8x1256xbf16, #tpu.memory_space<vmem>>, vector<8x1000xbf16>
    %c56 = arith.constant 56 : index
    %c0_31 = arith.constant 0 : index
    %39 = vector.load %arg9[%c56, %c0_31] : memref<216x1000xbf16, #tpu.memory_space<vmem>>, vector<8x1000xbf16>
    tpu.vector_store %arg9[%c56, %c0_31], %38 {strides = array<i32>} : memref<216x1000xbf16, #tpu.memory_space<vmem>>, vector<8x1000xbf16>,
    %c0_32 = arith.constant 0 : index
    %c39 = arith.constant 39 : index
    %40 = vector.load %arg8[%c0_32, %c39] : memref<8x1256xbf16, #tpu.memory_space<vmem>>, vector<8x1000xbf16>
    %c64 = arith.constant 64 : index
    %c0_33 = arith.constant 0 : index
    %41 = vector.load %arg9[%c64, %c0_33] : memref<216x1000xbf16, #tpu.memory_space<vmem>>, vector<8x1000xbf16>
    tpu.vector_store %arg9[%c64, %c0_33], %40 {strides = array<i32>} : memref<216x1000xbf16, #tpu.memory_space<vmem>>, vector<8x1000xbf16>,
    %c0_34 = arith.constant 0 : index
    %c117 = arith.constant 117 : index
    %42 = vector.load %arg8[%c0_34, %c117] : memref<8x1256xbf16, #tpu.memory_space<vmem>>, vector<8x1000xbf16>
    %c72 = arith.constant 72 : index
    %c0_35 = arith.constant 0 : index
    %43 = vector.load %arg9[%c72, %c0_35] : memref<216x1000xbf16, #tpu.memory_space<vmem>>, vector<8x1000xbf16>
    tpu.vector_store %arg9[%c72, %c0_35], %42 {strides = array<i32>} : memref<216x1000xbf16, #tpu.memory_space<vmem>>, vector<8x1000xbf16>,
    %c0_36 = arith.constant 0 : index
    %c118 = arith.constant 118 : index
    %44 = vector.load %arg8[%c0_36, %c118] : memref<8x1256xbf16, #tpu.memory_space<vmem>>, vector<8x1000xbf16>
    %c80 = arith.constant 80 : index
    %c0_37 = arith.constant 0 : index
    %45 = vector.load %arg9[%c80, %c0_37] : memref<216x1000xbf16, #tpu.memory_space<vmem>>, vector<8x1000xbf16>
    tpu.vector_store %arg9[%c80, %c0_37], %44 {strides = array<i32>} : memref<216x1000xbf16, #tpu.memory_space<vmem>>, vector<8x1000xbf16>,
    %c0_38 = arith.constant 0 : index
    %c119 = arith.constant 119 : index
    %46 = vector.load %arg8[%c0_38, %c119] : memref<8x1256xbf16, #tpu.memory_space<vmem>>, vector<8x1000xbf16>
    %c88 = arith.constant 88 : index
    %c0_39 = arith.constant 0 : index
    %47 = vector.load %arg9[%c88, %c0_39] : memref<216x1000xbf16, #tpu.memory_space<vmem>>, vector<8x1000xbf16>
    tpu.vector_store %arg9[%c88, %c0_39], %46 {strides = array<i32>} : memref<216x1000xbf16, #tpu.memory_space<vmem>>, vector<8x1000xbf16>,
    %c0_40 = arith.constant 0 : index
    %c127 = arith.constant 127 : index
    %48 = vector.load %arg8[%c0_40, %c127] : memref<8x1256xbf16, #tpu.memory_space<vmem>>, vector<8x1000xbf16>
    %c96 = arith.constant 96 : index
    %c0_41 = arith.constant 0 : index
    %49 = vector.load %arg9[%c96, %c0_41] : memref<216x1000xbf16, #tpu.memory_space<vmem>>, vector<8x1000xbf16>
    tpu.vector_store %arg9[%c96, %c0_41], %48 {strides = array<i32>} : memref<216x1000xbf16, #tpu.memory_space<vmem>>, vector<8x1000xbf16>,
    %c0_42 = arith.constant 0 : index
    %c128_43 = arith.constant 128 : index
    %50 = vector.load %arg8[%c0_42, %c128_43] : memref<8x1256xbf16, #tpu.memory_space<vmem>>, vector<8x1000xbf16>
    %c104 = arith.constant 104 : index
    %c0_44 = arith.constant 0 : index
    %51 = vector.load %arg9[%c104, %c0_44] : memref<216x1000xbf16, #tpu.memory_space<vmem>>, vector<8x1000xbf16>
    tpu.vector_store %arg9[%c104, %c0_44], %50 {strides = array<i32>} : memref<216x1000xbf16, #tpu.memory_space<vmem>>, vector<8x1000xbf16>,
    %c0_45 = arith.constant 0 : index
    %c129 = arith.constant 129 : index
    %52 = vector.load %arg8[%c0_45, %c129] : memref<8x1256xbf16, #tpu.memory_space<vmem>>, vector<8x1000xbf16>
    %c112 = arith.constant 112 : index
    %c0_46 = arith.constant 0 : index
    %53 = vector.load %arg9[%c112, %c0_46] : memref<216x1000xbf16, #tpu.memory_space<vmem>>, vector<8x1000xbf16>
    tpu.vector_store %arg9[%c112, %c0_46], %52 {strides = array<i32>} : memref<216x1000xbf16, #tpu.memory_space<vmem>>, vector<8x1000xbf16>,
    %c0_47 = arith.constant 0 : index
    %c137 = arith.constant 137 : index
    %54 = vector.load %arg8[%c0_47, %c137] : memref<8x1256xbf16, #tpu.memory_space<vmem>>, vector<8x1000xbf16>
    %c120 = arith.constant 120 : index
    %c0_48 = arith.constant 0 : index
    %55 = vector.load %arg9[%c120, %c0_48] : memref<216x1000xbf16, #tpu.memory_space<vmem>>, vector<8x1000xbf16>
    tpu.vector_store %arg9[%c120, %c0_48], %54 {strides = array<i32>} : memref<216x1000xbf16, #tpu.memory_space<vmem>>, vector<8x1000xbf16>,
    %c0_49 = arith.constant 0 : index
    %c138 = arith.constant 138 : index
    %56 = vector.load %arg8[%c0_49, %c138] : memref<8x1256xbf16, #tpu.memory_space<vmem>>, vector<8x1000xbf16>
    %c128_50 = arith.constant 128 : index
    %c0_51 = arith.constant 0 : index
    %57 = vector.load %arg9[%c128_50, %c0_51] : memref<216x1000xbf16, #tpu.memory_space<vmem>>, vector<8x1000xbf16>
    tpu.vector_store %arg9[%c128_50, %c0_51], %56 {strides = array<i32>} : memref<216x1000xbf16, #tpu.memory_space<vmem>>, vector<8x1000xbf16>,
    %c0_52 = arith.constant 0 : index
    %c139 = arith.constant 139 : index
    %58 = vector.load %arg8[%c0_52, %c139] : memref<8x1256xbf16, #tpu.memory_space<vmem>>, vector<8x1000xbf16>
    %c136 = arith.constant 136 : index
    %c0_53 = arith.constant 0 : index
    %59 = vector.load %arg9[%c136, %c0_53] : memref<216x1000xbf16, #tpu.memory_space<vmem>>, vector<8x1000xbf16>
    tpu.vector_store %arg9[%c136, %c0_53], %58 {strides = array<i32>} : memref<216x1000xbf16, #tpu.memory_space<vmem>>, vector<8x1000xbf16>,
    %c0_54 = arith.constant 0 : index
    %c217 = arith.constant 217 : index
    %60 = vector.load %arg8[%c0_54, %c217] : memref<8x1256xbf16, #tpu.memory_space<vmem>>, vector<8x1000xbf16>
    %c144 = arith.constant 144 : index
    %c0_55 = arith.constant 0 : index
    %61 = vector.load %arg9[%c144, %c0_55] : memref<216x1000xbf16, #tpu.memory_space<vmem>>, vector<8x1000xbf16>
    tpu.vector_store %arg9[%c144, %c0_55], %60 {strides = array<i32>} : memref<216x1000xbf16, #tpu.memory_space<vmem>>, vector<8x1000xbf16>,
    %c0_56 = arith.constant 0 : index
    %c218 = arith.constant 218 : index
    %62 = vector.load %arg8[%c0_56, %c218] : memref<8x1256xbf16, #tpu.memory_space<vmem>>, vector<8x1000xbf16>
    %c152 = arith.constant 152 : index
    %c0_57 = arith.constant 0 : index
    %63 = vector.load %arg9[%c152, %c0_57] : memref<216x1000xbf16, #tpu.memory_space<vmem>>, vector<8x1000xbf16>
    tpu.vector_store %arg9[%c152, %c0_57], %62 {strides = array<i32>} : memref<216x1000xbf16, #tpu.memory_space<vmem>>, vector<8x1000xbf16>,
    %c0_58 = arith.constant 0 : index
    %c219 = arith.constant 219 : index
    %64 = vector.load %arg8[%c0_58, %c219] : memref<8x1256xbf16, #tpu.memory_space<vmem>>, vector<8x1000xbf16>
    %c160 = arith.constant 160 : index
    %c0_59 = arith.constant 0 : index
    %65 = vector.load %arg9[%c160, %c0_59] : memref<216x1000xbf16, #tpu.memory_space<vmem>>, vector<8x1000xbf16>
    tpu.vector_store %arg9[%c160, %c0_59], %64 {strides = array<i32>} : memref<216x1000xbf16, #tpu.memory_space<vmem>>, vector<8x1000xbf16>,
    %c0_60 = arith.constant 0 : index
    %c227 = arith.constant 227 : index
    %66 = vector.load %arg8[%c0_60, %c227] : memref<8x1256xbf16, #tpu.memory_space<vmem>>, vector<8x1000xbf16>
    %c168 = arith.constant 168 : index
    %c0_61 = arith.constant 0 : index
    %67 = vector.load %arg9[%c168, %c0_61] : memref<216x1000xbf16, #tpu.memory_space<vmem>>, vector<8x1000xbf16>
    tpu.vector_store %arg9[%c168, %c0_61], %66 {strides = array<i32>} : memref<216x1000xbf16, #tpu.memory_space<vmem>>, vector<8x1000xbf16>,
    %c0_62 = arith.constant 0 : index
    %c228 = arith.constant 228 : index
    %68 = vector.load %arg8[%c0_62, %c228] : memref<8x1256xbf16, #tpu.memory_space<vmem>>, vector<8x1000xbf16>
    %c176 = arith.constant 176 : index
    %c0_63 = arith.constant 0 : index
    %69 = vector.load %arg9[%c176, %c0_63] : memref<216x1000xbf16, #tpu.memory_space<vmem>>, vector<8x1000xbf16>
    tpu.vector_store %arg9[%c176, %c0_63], %68 {strides = array<i32>} : memref<216x1000xbf16, #tpu.memory_space<vmem>>, vector<8x1000xbf16>,
    %c0_64 = arith.constant 0 : index
    %c229 = arith.constant 229 : index
    %70 = vector.load %arg8[%c0_64, %c229] : memref<8x1256xbf16, #tpu.memory_space<vmem>>, vector<8x1000xbf16>
    %c184 = arith.constant 184 : index
    %c0_65 = arith.constant 0 : index
    %71 = vector.load %arg9[%c184, %c0_65] : memref<216x1000xbf16, #tpu.memory_space<vmem>>, vector<8x1000xbf16>
    tpu.vector_store %arg9[%c184, %c0_65], %70 {strides = array<i32>} : memref<216x1000xbf16, #tpu.memory_space<vmem>>, vector<8x1000xbf16>,
    %c0_66 = arith.constant 0 : index
    %c237 = arith.constant 237 : index
    %72 = vector.load %arg8[%c0_66, %c237] : memref<8x1256xbf16, #tpu.memory_space<vmem>>, vector<8x1000xbf16>
    %c192 = arith.constant 192 : index
    %c0_67 = arith.constant 0 : index
    %73 = vector.load %arg9[%c192, %c0_67] : memref<216x1000xbf16, #tpu.memory_space<vmem>>, vector<8x1000xbf16>
    tpu.vector_store %arg9[%c192, %c0_67], %72 {strides = array<i32>} : memref<216x1000xbf16, #tpu.memory_space<vmem>>, vector<8x1000xbf16>,
    %c0_68 = arith.constant 0 : index
    %c238 = arith.constant 238 : index
    %74 = vector.load %arg8[%c0_68, %c238] : memref<8x1256xbf16, #tpu.memory_space<vmem>>, vector<8x1000xbf16>
    %c200 = arith.constant 200 : index
    %c0_69 = arith.constant 0 : index
    %75 = vector.load %arg9[%c200, %c0_69] : memref<216x1000xbf16, #tpu.memory_space<vmem>>, vector<8x1000xbf16>
    tpu.vector_store %arg9[%c200, %c0_69], %74 {strides = array<i32>} : memref<216x1000xbf16, #tpu.memory_space<vmem>>, vector<8x1000xbf16>,
    %c0_70 = arith.constant 0 : index
    %c239 = arith.constant 239 : index
    %76 = vector.load %arg8[%c0_70, %c239] : memref<8x1256xbf16, #tpu.memory_space<vmem>>, vector<8x1000xbf16>
    %c208 = arith.constant 208 : index
    %c0_71 = arith.constant 0 : index
    %77 = vector.load %arg9[%c208, %c0_71] : memref<216x1000xbf16, #tpu.memory_space<vmem>>, vector<8x1000xbf16>
    tpu.vector_store %arg9[%c208, %c0_71], %76 {strides = array<i32>} : memref<216x1000xbf16, #tpu.memory_space<vmem>>, vector<8x1000xbf16>,
    %c0_72 = arith.constant 0 : index
    %c0_73 = arith.constant 0 : index
    %78 = vector.load %arg5[%c0_72, %c0_73] : memref<8x216xbf16, #tpu.memory_space<vmem>>, vector<8x216xbf16>
    %c0_74 = arith.constant 0 : index
    %c0_75 = arith.constant 0 : index
    %79 = vector.load %arg9[%c0_74, %c0_75] : memref<216x1000xbf16, #tpu.memory_space<vmem>>, vector<216x1000xbf16>
    %cst_76 = arith.constant dense<0.000000e+00> : vector<8x1000xf32>
    %80 = tpu.matmul %78, %79, %cst_76 {dimension_numbers = #tpu.dot_dimension_numbers<[1], [0], [0], [1], [0, 0, 1, 1], [], []>} : vector<8x216xbf16>, vector<216x1000xbf16>, vector<8x1000xf32> -> vector<8x1000xf32>
    %c0_77 = arith.constant 0 : index
    %c0_78 = arith.constant 0 : index
    %81 = vector.load %arg6[%c0_77, %c0_78] : memref<8x1xf32, #tpu.memory_space<vmem>>, vector<8x1xf32>
    %82 = vector.broadcast %81 : vector<8x1xf32> to vector<8x1000xf32>
    %83 = arith.addf %80, %82 : vector<8x1000xf32>
    %c0_79 = arith.constant 0 : index
    %c0_80 = arith.constant 0 : index
    %c0_81 = arith.constant 0 : index
    %84 = vector.load %arg7[%c0_79, %c0_80, %c0_81] : memref<1x8x1000xf32, #tpu.memory_space<vmem>>, vector<1x8x1000xf32>
    %85 = vector.shape_cast %84 : vector<1x8x1000xf32> to vector<8x1000xf32>
    %86 = vector.shape_cast %83 : vector<8x1000xf32> to vector<1x8x1000xf32>
    tpu.vector_store %arg7[%c0_79, %c0_80, %c0_81], %86 {strides = array<i32>} : memref<1x8x1000xf32, #tpu.memory_space<vmem>>, vector<1x8x1000xf32>,
    return
  }
  func.func @transform_0(%arg0: i32) -> (i32, i32, i32) {
    %c0_i32 = arith.constant 0 : i32
    %c0_i32_0 = arith.constant 0 : i32
    %c0_i32_1 = arith.constant 0 : i32
    return %arg0, %c0_i32, %c0_i32_0 : i32, i32, i32
  }
  func.func @transform_1(%arg0: i32) -> (i32, i32, i32) {
    %c0_i32 = arith.constant 0 : i32
    %c0_i32_0 = arith.constant 0 : i32
    %c0_i32_1 = arith.constant 0 : i32
    return %arg0, %c0_i32, %c0_i32_0 : i32, i32, i32
  }
  func.func @transform_2(%arg0: i32) -> (i32, i32, i32) {
    %c0_i32 = arith.constant 0 : i32
    %c0_i32_0 = arith.constant 0 : i32
    %c0_i32_1 = arith.constant 0 : i32
    return %arg0, %c0_i32, %c0_i32_0 : i32, i32, i32
  }
  func.func @transform_3(%arg0: i32) -> (i32, i32) {
    %c0_i32 = arith.constant 0 : i32
    %c0_i32_0 = arith.constant 0 : i32
    %c0_i32_1 = arith.constant 0 : i32
    return %c0_i32, %c0_i32_0 : i32, i32
  }
  func.func @transform_4(%arg0: i32) -> (i32, i32) {
    %c0_i32 = arith.constant 0 : i32
    %c0_i32_0 = arith.constant 0 : i32
    %c0_i32_1 = arith.constant 0 : i32
    return %c0_i32, %c0_i32_0 : i32, i32
  }
  func.func @transform_5(%arg0: i32) -> (i32, i32) {
    %c0_i32 = arith.constant 0 : i32
    %c0_i32_0 = arith.constant 0 : i32
    %c0_i32_1 = arith.constant 0 : i32
    return %c0_i32, %c0_i32_0 : i32, i32
  }
  func.func @transform_6(%arg0: i32) -> (i32, i32, i32) {
    %c0_i32 = arith.constant 0 : i32
    %c0_i32_0 = arith.constant 0 : i32
    %c0_i32_1 = arith.constant 0 : i32
    return %arg0, %c0_i32, %c0_i32_0 : i32, i32, i32
  }
}

</mosaic_0001>

<bundles_post_ra>
// kernel: block_forward.2
= control target key start
LH: loop header
LB: loop body
LE: loop exit
PB: predicated region body
PF: predicated region fallthrough
CT: control target
= control target key end

     0   :  { %s301_s9 = smov 0   ;;  %s321_s0 = inlined_call_operand.vmem [shape: f32[2,8,512], index: 0, kind: input, shape index: {}]   ;;  %s322_s1 = inlined_call_operand.vmem [shape: f32[2,8,1], index: 1, kind: output, shape index: {0}]   ;;  %s323_s2 = inlined_call_operand.vmem [shape: f32[2,8,1], index: 2, kind: output, shape index: {1}]  }
   0x1 LB: > { %s258_s10 = sadd.s32 4294967295, %s284_s9   ;;  %p262_p0 = scmp.ge.s32.totalorder %s284_s9, 1  ;;  %s284_s9 = sphi %s301_s9, %s13_s9  }
   0x2   : > { %p115_p1 = scmp.lt.s32.totalorder %s284_s9, 3 }
   0x4   : > { %p116_p2 = pnand %p262_p0, %p115_p1 }
   0x5   : > { %p140_p3 = scmp.lt.s32.totalorder (!%p116_p2), %s258_s10, 1 }
   0x6   : > { %119 = sbr.rel (%p116_p2) target bundleno = 164 (0xa4), region = 24 }
   0xb   : > { %s325_s10 = smov (!%p140_p3, %s258_s10), 1  ;;  %vm162_vm0 = vcmask 7168  }
   0xc   : > { %s269_s11 = sshll.u32 %s325_s10, 5  ;;  %s265_s15 = sshll.u32 %s325_s10, 3 }
   0xd   : > { %s144_s14 = scalar_lea.vmem %s321_s0, %s269_s11  ;;  %s148_s18 = scalar_lea.vmem %s322_s1, %s265_s15 }
   0xe   : > { %v153_v0 = vld [vmem:[%s144_s14] sm:$0xff]  ;;  %v154_v1 = vld [vmem:[%s144_s14 + $0x8] sm:$0xff]  ;;  %v155_v2 = vld [vmem:[%s144_s14 + $0x10] sm:$0xff]  ;;  %s152_s21 = scalar_lea.vmem %s323_s2, %s265_s15 }
   0xf   : > { %v157_v3 = vadd.f32 %v154_v1, %v153_v0  ;;  %v164_v4 = vmul.f32 %v153_v0, %v153_v0  ;;  %v165_v5 = vmul.f32 %v154_v1, %v154_v1  ;;  %v166_v6 = vmul.f32 %v155_v2, %v155_v2  ;;  %v156_v7 = vld [vmem:[%s144_s14 + $0x18] sm:$0xff] }
  0x10   : > { %v167_v9 = vmul.f32 %v156_v7, %v156_v7 }
  0x11   : > { %v158_v8 = vadd.f32 %v157_v3, %v155_v2  ;;  %v168_v10 = vadd.f32 %v165_v5, %v164_v4 }
  0x13   : > { %v159_v11 = vadd.f32 %v158_v8, %v156_v7  ;;  %v169_v12 = vadd.f32 %v168_v10, %v166_v6 }
  0x15   : > { %160 = vadd.xlane.f32.xlu0 %v159_v11  ;;  %v170_v13 = vadd.f32 %v169_v12, %v167_v9 }
  0x19   : > { %171 = vadd.xlane.f32.xlu0 %v170_v13 }
  0x9e   : > { %v161_v14 = vpop.xlane.xlu0 %160 }
  0x9f   : > { %163 = vst.msk [vmem:[%s148_s18] sm:$0xff] %vm162_vm0, %v161_v14 }
  0xa2   : > { %v172_v15 = vpop.xlane.xlu0 %171 }
  0xa3   : > { %173 = vst.msk [vmem:[%s152_s21] sm:$0xff] %vm162_vm0, %v172_v15 }
  0xa4 PF: > { %s13_s9 = sadd.s32 1, %s284_s9  }
  0xa5   : > { %p10_p4 = scmp.ge.s32.totalorder %s13_s9, 4  }
  0xa7   :  { %12 = sbr.rel (!%p10_p4) target bundleno = 1 (0x1), region = 66 }

// kernel: block_forward.3
= control target key start
LH: loop header
LB: loop body
LE: loop exit
PB: predicated region body
PF: predicated region fallthrough
CT: control target
= control target key end

     0   :  { %s2769_s21 = smov 0   ;;  %s3558_s0 = inlined_call_operand.vmem [shape: f32[2,8,1000], index: 0, kind: input, shape index: {}]   ;;  %s3559_s1 = inlined_call_operand.vmem [shape: f32[2,8,1], index: 1, kind: input, shape index: {}]   ;;  %s3560_s2 = inlined_call_operand.vmem [shape: f32[2,8,1], index: 2, kind: input, shape index: {}]   ;;  %s3561_s3 = inlined_call_operand.vmem [shape: f32[1,1000], index: 3, kind: input, shape index: {}]   ;;  %s3562_s4 = inlined_call_operand.vmem [shape: bf16[8,216], index: 4, kind: input, shape index: {}]   ;;  %s3563_s5 = inlined_call_operand.vmem [shape: f32[8,1], index: 5, kind: input, shape index: {}]   ;;  %s3564_s6 = inlined_call_operand.vmem [shape: f32[2,8,1000], index: 6, kind: output, shape index: {}]  }
   0x1 LB: > { %s2472_s22 = sadd.s32 4294967295, %s2705_s21   ;;  %p2476_p0 = scmp.ge.s32.totalorder %s2705_s21, 1  ;;  %s2705_s21 = sphi %s2769_s21, %s16_s21  }
   0x2   : > { %p230_p1 = scmp.lt.s32.totalorder %s2705_s21, 3 }
   0x4   : > { %p231_p2 = pnand %p2476_p0, %p230_p1 }
   0x5   : > { %p268_p3 = scmp.lt.s32.totalorder (!%p231_p2), %s2472_s22, 1  ;;  %s2708_s12 = smov (!%p231_p2), 127  }
   0x6   : > { %234 = sbr.rel (%p231_p2) target bundleno = 760 (0x2f8), region = 44  ;;  %s2709_s13 = smov (!%p231_p2), 119  }
   0x7   : > { %s2710_s14 = smov (!%p231_p2), 1   ;;  %s2711_s15 = smov (!%p231_p2), 10  }
   0x8   : > { %s2712_s16 = smov (!%p231_p2), 9   ;;  %s2713_s17 = smov (!%p231_p2), 89  }
   0x9   : > { %s2714_s18 = smov (!%p231_p2), 11   ;;  %s2715_s19 = smov (!%p231_p2), 91  }
   0xa   : > { %s2716_s20 = smov (!%p231_p2), 90   ;;  %s2718_s24 = smov (!%p231_p2), 99  }
   0xb   : > { %vm438_vm0 = vcmask 1044288   ;;  %vm439_vm1 = vcmask 850948   ;;  %v2707_v0 = vmov 0   ;;  %s3639_s22 = smov (!%p268_p3, %s2472_s22), 1  ;;  %v381_v43 = vlaneseq  ;;  %v379_v56 = vld [vmem:[%s3561_s3] sm:$0xff]  ;;  %s2719_s25 = smov 109  }
   0xc   : > { %vm440_vm2 = vmor %vm439_vm1, %vm438_vm0  ;;  %2660 = vset.pattern.permute.xlu0 %v2707_v0  ;;  %437 = vst [vmem:[#allocation2] sm:$0xf] %v2707_v0  ;;  %2661 = vset.pattern.permute.xlu1 %v2707_v0  ;;  %s2479_s23 = sshll.u32 %s3639_s22, 3  ;;  %s3565_s30 = sshll.u32 %s3639_s22, 6  ;;  %vm469_vm3 = vcmask 1043456   ;;  %vm1030_vm5 = vcmask 1039360  }
   0xd   : > { %441 = vst.msk [vmem:[#allocation2 + $0x20] sm:$0xff] %vm440_vm2, %v2707_v0  ;;  %s276_s26 = scalar_lea.vmem %s3559_s1, %s2479_s23  ;;  %s280_s29 = scalar_lea.vmem %s3560_s2, %s2479_s23  ;;  %v382_v52 = vshrl.u32 %v381_v43, 7  ;;  %vm2840_vm4 = vmor %vm439_vm1, %vm469_vm3  ;;  %vm1066_vm6 = vcmask 973824   ;;  %vm985_vm7 = vcmask 7168   ;;  %vm901_vm8 = vcmask 80896  }
   0xe   : > { %v295_v1 = vld [vmem:[%s276_s26] sm:$0xff]  ;;  %s272_s9 = scalar_lea.vmem %s3558_s0, %s3565_s30  ;;  %s2717_s23 = smov 100   ;;  %vm943_vm9 = vcmask 72704   ;;  %vm817_vm10 = vcmask 728064   ;;  %vm859_vm11 = vcmask 89088   ;;  %vm733_vm12 = vcmask 744448  }
   0xf   : > { %298 = vperm.xlu0 %2660, %v295_v1   ;;  %v309_v2 = vld [vmem:[%s280_s29] sm:$0xff]  ;;  %v288_v4 = vld [vmem:[%s272_s9 + $0x8] sm:$0xff]  ;;  %v289_v5 = vld [vmem:[%s272_s9 + $0x10] sm:$0xff]  ;;  %v383_v55 = vsub.s32 0, %v382_v52  ;;  %v387_v57 = vsub.s32 1, %v382_v52  ;;  %v391_v58 = vsub.s32 2, %v382_v52 }
  0x10   : > { %v287_v3 = vld [vmem:[%s272_s9] sm:$0xff]  ;;  %v290_v6 = vld [vmem:[%s272_s9 + $0x18] sm:$0xff]  ;;  %v292_v9 = vld [vmem:[%s272_s9 + $0x28] sm:$0xff]  ;;  %v395_v59 = vsub.s32 3, %v382_v52  ;;  %v399_v61 = vsub.s32 4, %v382_v52  ;;  %v403_v0 = vsub.s32 5, %v382_v52 }
  0x11   : > { %v291_v8 = vld [vmem:[%s272_s9 + $0x20] sm:$0xff]  ;;  %v293_v10 = vld [vmem:[%s272_s9 + $0x30] sm:$0xff]  ;;  %v294_v11 = vld [vmem:[%s272_s9 + $0x38] sm:$0xff]  ;;  %v384_v60 = vrot.slane %v379_v56, %v383_v55  ;;  %v388_v63 = vrot.slane %v379_v56, %v387_v57  ;;  %s2720_s26 = smov 101   ;;  %s2721_s27 = smov 111   ;;  %vm2192_vm13 = vcmask 719872  }
  0x12   : > { %s2722_s28 = smov 110   ;;  %s2723_s29 = smov 17   ;;  %vm775_vm14 = vcmask 736256   ;;  %vm649_vm15 = vcmask 818176   ;;  %vm691_vm0 = vcmask 809984   ;;  %vm3575_vm1 = vcmask 891904  }
  0x13   : > { %312 = vperm.xlu0 %2660, %v309_v2   ;;  %v392_v2 = vrot.slane %v379_v56, %v391_v58  ;;  %s2724_s7 = smov 19   ;;  %s2725_s8 = smov 18   ;;  %vm3576_vm2 = vcmask 826368  }
  0x14   : > { %s2726_s9 = smov 28   ;;  %s2727_s10 = smov 27  }
  0x15   : > { %s3566_s11 = smov 37   ;;  %s3568_s30 = smov 29  }
  0x8a   : > { %v299_v7 = vpop.permute.xlu0 %298 }
  0x8b   : > { %v301_v12 = vmul.f32 %v299_v7, %v287_v3  ;;  %v302_v13 = vmul.f32 %v299_v7, %v288_v4  ;;  %v303_v14 = vmul.f32 %v299_v7, %v289_v5  ;;  %v304_v15 = vmul.f32 %v299_v7, %v290_v6 }
  0x8c   : > { %v305_v16 = vmul.f32 %v299_v7, %v291_v8  ;;  %v306_v17 = vmul.f32 %v299_v7, %v292_v9  ;;  %v307_v18 = vmul.f32 %v299_v7, %v293_v10  ;;  %v308_v24 = vmul.f32 %v299_v7, %v294_v11 }
  0x8d   : > { %v407_v3 = vsub.s32 6, %v382_v52  ;;  %v396_v6 = vrot.slane %v379_v56, %v395_v59  ;;  %v411_v7 = vsub.s32 7, %v382_v52  ;;  %v400_v10 = vrot.slane %v379_v56, %v399_v61 }
  0x8e   : > { %v313_v19 = vpop.permute.xlu0 %312 }
  0x8f   : > { %v2793_v20 = vadd.f32 %v313_v19, %v301_v12  ;;  %v2795_v21 = vadd.f32 %v313_v19, %v302_v13  ;;  %v2797_v22 = vadd.f32 %v313_v19, %v303_v14  ;;  %v2799_v23 = vadd.f32 %v313_v19, %v304_v15 }
  0x90   : > { %v2801_v25 = vadd.f32 %v313_v19, %v305_v16  ;;  %v2803_v26 = vadd.f32 %v313_v19, %v306_v17  ;;  %v2805_v27 = vadd.f32 %v313_v19, %v307_v18  ;;  %v2810_v31 = vadd.f32 %v313_v19, %v308_v24 }
  0x91   : > { %v2483_v28 = vmul.f32 -1.442695, %v2793_v20  ;;  %v2484_v29 = vmul.f32 -1.442695, %v2795_v21  ;;  %v2485_v30 = vmul.f32 -1.442695, %v2797_v22  ;;  %v404_v14 = vrot.slane %v379_v56, %v403_v0 }
  0x92   : > { %v2486_v32 = vmul.f32 -1.442695, %v2799_v23  ;;  %v2487_v33 = vmul.f32 -1.442695, %v2801_v25  ;;  %v2488_v34 = vmul.f32 -1.442695, %v2803_v26  ;;  %v408_v18 = vrot.slane %v379_v56, %v407_v3 }
  0x93   : > { %2666 = vpow2.f32 %v2483_v28  ;;  %v2489_v35 = vmul.f32 -1.442695, %v2805_v27  ;;  %v2490_v36 = vmul.f32 -1.442695, %v2810_v31  ;;  %v412_v28 = vrot.slane %v379_v56, %v411_v7 }
  0x94   : > { %2668 = vpow2.f32 %v2484_v29 }
  0x95   : > { %2670 = vpow2.f32 %v2485_v30 }
  0x96   : > { %2672 = vpow2.f32 %v2486_v32 }
  0x97   : > { %2674 = vpow2.f32 %v2487_v33 }
  0x98   : > { %2676 = vpow2.f32 %v2488_v34 }
  0x99   : > { %2678 = vpow2.f32 %v2489_v35 }
  0x9a   : > { %2680 = vpow2.f32 %v2490_v36 }
  0xa0   : > { %v2667_v37 = vpop.eup %2666 }
  0xa1   : > { %v2669_v38 = vpop.eup %2668  ;;  %v347_v39 = vadd.f32 1.0, %v2667_v37 }
  0xa2   : > { %v2671_v40 = vpop.eup %2670  ;;  %v348_v41 = vadd.f32 1.0, %v2669_v38 }
  0xa3   : > { %v2673_v42 = vpop.eup %2672  ;;  %v349_v44 = vadd.f32 1.0, %v2671_v40  ;;  %2682 = vrcp.f32 %v347_v39 }
  0xa4   : > { %v2675_v45 = vpop.eup %2674  ;;  %v350_v46 = vadd.f32 1.0, %v2673_v42  ;;  %2684 = vrcp.f32 %v348_v41 }
  0xa5   : > { %v2677_v47 = vpop.eup %2676  ;;  %v351_v48 = vadd.f32 1.0, %v2675_v45  ;;  %2686 = vrcp.f32 %v349_v44 }
  0xa6   : > { %v2679_v49 = vpop.eup %2678  ;;  %v352_v50 = vadd.f32 1.0, %v2677_v47  ;;  %2688 = vrcp.f32 %v350_v46 }
  0xa7   : > { %v2681_v51 = vpop.eup %2680  ;;  %v353_v53 = vadd.f32 1.0, %v2679_v49  ;;  %2690 = vrcp.f32 %v351_v48 }
  0xa8   : > { %v354_v54 = vadd.f32 1.0, %v2681_v51  ;;  %2692 = vrcp.f32 %v352_v50 }
  0xa9   : > { %2694 = vrcp.f32 %v353_v53 }
  0xaa   : > { %2696 = vrcp.f32 %v354_v54 }
  0xb0   : > { %v2683_v62 = vpop.eup %2682 }
  0xb1   : > { %v2685_v1 = vpop.eup %2684  ;;  %v371_v4 = vmul.f32 %v2683_v62, %v2793_v20 }
  0xb2   : > { %v2687_v5 = vpop.eup %2686  ;;  %v372_v8 = vmul.f32 %v2685_v1, %v2795_v21 }
  0xb3   : > { %v2689_v9 = vpop.eup %2688  ;;  %v373_v11 = vmul.f32 %v2687_v5, %v2797_v22  ;;  %v421_v12 = vmul.f32 %v384_v60, %v371_v4 }
  0xb4   : > { %v2691_v13 = vpop.eup %2690  ;;  %v374_v15 = vmul.f32 %v2689_v9, %v2799_v23  ;;  %v422_v16 = vmul.f32 %v388_v63, %v372_v8 }
  0xb5   : > { %v2693_v17 = vpop.eup %2692  ;;  %v375_v19 = vmul.f32 %v2691_v13, %v2801_v25  ;;  %v423_v20 = vmul.f32 %v392_v2, %v373_v11 }
  0xb6   : > { %v2695_v24 = vpop.eup %2694  ;;  %v376_v29 = vmul.f32 %v2693_v17, %v2803_v26  ;;  %v424_v21 = vmul.f32 %v396_v6, %v374_v15  ;;  %v2826_v30 = vpack.c.bf16 %v422_v16, %v421_v12 }
  0xb7   : > { %v2697_v32 = vpop.eup %2696  ;;  %v377_v22 = vmul.f32 %v2695_v24, %v2805_v27  ;;  %v425_v33 = vmul.f32 %v400_v10, %v375_v19 }
  0xb8   : > { %v378_v23 = vmul.f32 %v2697_v32, %v2810_v31  ;;  %v426_v34 = vmul.f32 %v404_v14, %v376_v29  ;;  %v2830_v35 = vpack.c.bf16 %v424_v21, %v423_v20  ;;  %466 = vst [vmem:[#allocation2 + $0x4] sm:$0xff] %v2826_v30  ;;  %1017 = vrot.lane.b32.xlu1 %v2826_v30, %s2708_s12 }
  0xb9   : > { %v427_v25 = vmul.f32 %v408_v18, %v377_v22 }
  0xba   : > { %v428_v26 = vmul.f32 %v412_v28, %v378_v23  ;;  %v2835_v36 = vpack.c.bf16 %v426_v34, %v425_v33  ;;  %467 = vst [vmem:[#allocation2 + $0xc] sm:$0xff] %v2830_v35 }
  0xbc   : > { %v2624_v31 = vpack.c.bf16 %v428_v26, %v427_v25  ;;  %468 = vst [vmem:[#allocation2 + $0x14] sm:$0xff] %v2835_v36  ;;  %1021 = vrot.lane.b32.xlu0 %v2835_v36, %s2708_s12  ;;  %1019 = vrot.lane.b32.xlu1 %v2830_v35, %s2708_s12 }
  0xbe   : > { %471 = vst.msk [vmem:[#allocation2 + $0x1c] sm:$0xff] %vm2840_vm4, %v2624_v31 }
  0xbf   : > { %v959_v37 = vld [vmem:[#allocation2] sm:$0xff] }
  0xc0   : > { %1055 = vrot.lane.b32.xlu0 %v2830_v35, %s2709_s13  ;;  %1053 = vrot.lane.b32.xlu1 %v2826_v30, %s2709_s13 }
  0xc1   : > { %v960_v40 = vld [vmem:[#allocation2 + $0x8] sm:$0xff] }
  0xc3   : > { %v1003_v38 = vld [vmem:[#allocation2 + $0x14] sm:$0xff] }
  0xc4   : > { %969 = vrot.lane.b32.xlu0 %v959_v37, %s2710_s14  ;;  %1057 = vrot.lane.b32.xlu1 %v2835_v36, %s2709_s13  ;;  %1007 = vst [vmem:[#allocation3 + $0x1b0] sm:$0xff] %v1003_v38  ;;  %v961_v39 = vld [vmem:[#allocation2 + $0x10] sm:$0xff] }
  0xc5   : > { %v1004_v41 = vld [vmem:[#allocation2 + $0x1c] sm:$0xff] }
  0xc6   : > { %1008 = vst.msk [vmem:[#allocation3 + $0x1b8] sm:$0xff] %vm2840_vm4, %v1004_v41 }
  0xc8   : > { %973 = vrot.lane.b32.xlu0 %v961_v39, %s2710_s14  ;;  %971 = vrot.lane.b32.xlu1 %v960_v40, %s2710_s14 }
  0xcc   : > { %887 = vrot.lane.b32.xlu0 %v960_v40, %s2711_s15  ;;  %885 = vrot.lane.b32.xlu1 %v959_v37, %s2711_s15 }
  0xd0   : > { %927 = vrot.lane.b32.xlu0 %v959_v37, %s2712_s16  ;;  %889 = vrot.lane.b32.xlu1 %v961_v39, %s2711_s15 }
  0xd4   : > { %931 = vrot.lane.b32.xlu0 %v961_v39, %s2712_s16  ;;  %929 = vrot.lane.b32.xlu1 %v960_v40, %s2712_s16 }
  0xd8   : > { %803 = vrot.lane.b32.xlu0 %v960_v40, %s2713_s17  ;;  %801 = vrot.lane.b32.xlu1 %v959_v37, %s2713_s17 }
  0xdc   : > { %843 = vrot.lane.b32.xlu0 %v959_v37, %s2714_s18  ;;  %805 = vrot.lane.b32.xlu1 %v961_v39, %s2713_s17 }
  0xe0   : > { %847 = vrot.lane.b32.xlu0 %v961_v39, %s2714_s18  ;;  %845 = vrot.lane.b32.xlu1 %v960_v40, %s2714_s18 }
  0xe4   : > { %719 = vrot.lane.b32.xlu0 %v960_v40, %s2715_s19  ;;  %717 = vrot.lane.b32.xlu1 %v959_v37, %s2715_s19 }
  0xe8   : > { %759 = vrot.lane.b32.xlu0 %v959_v37, %s2716_s20  ;;  %721 = vrot.lane.b32.xlu1 %v961_v39, %s2715_s19 }
  0xec   : > { %763 = vrot.lane.b32.xlu0 %v961_v39, %s2716_s20  ;;  %761 = vrot.lane.b32.xlu1 %v960_v40, %s2716_s20 }
  0xf0   : > { %635 = vrot.lane.b32.xlu0 %v960_v40, %s2717_s23  ;;  %633 = vrot.lane.b32.xlu1 %v959_v37, %s2717_s23 }
  0xf4   : > { %675 = vrot.lane.b32.xlu0 %v959_v37, %s2718_s24  ;;  %637 = vrot.lane.b32.xlu1 %v961_v39, %s2717_s23 }
  0xf8   : > { %679 = vrot.lane.b32.xlu0 %v961_v39, %s2718_s24  ;;  %677 = vrot.lane.b32.xlu1 %v960_v40, %s2718_s24 }
  0xfc   : > { %555 = vrot.lane.b32.xlu0 %v960_v40, %s2719_s25  ;;  %553 = vrot.lane.b32.xlu1 %v959_v37, %s2719_s25 }
 0x100   : > { %591 = vrot.lane.b32.xlu0 %v959_v37, %s2720_s26  ;;  %557 = vrot.lane.b32.xlu1 %v961_v39, %s2719_s25 }
 0x104   : > { %595 = vrot.lane.b32.xlu0 %v961_v39, %s2720_s26  ;;  %593 = vrot.lane.b32.xlu1 %v960_v40, %s2720_s26 }
 0x108   : > { %482 = vrot.lane.b32.xlu0 %v960_v40, %s2721_s27  ;;  %480 = vrot.lane.b32.xlu1 %v959_v37, %s2721_s27 }
 0x10c   : > { %517 = vrot.lane.b32.xlu0 %v959_v37, %s2722_s28  ;;  %484 = vrot.lane.b32.xlu1 %v961_v39, %s2721_s27 }
 0x110   : > { %521 = vrot.lane.b32.xlu0 %v961_v39, %s2722_s28  ;;  %519 = vrot.lane.b32.xlu1 %v960_v40, %s2722_s28 }
 0x114   : > { %1501 = vrot.lane.b32.xlu0 %v2830_v35, %s2723_s29  ;;  %1499 = vrot.lane.b32.xlu1 %v2826_v30, %s2723_s29 }
 0x118   : > { %1415 = vrot.lane.b32.xlu0 %v2826_v30, %s2724_s7  ;;  %1503 = vrot.lane.b32.xlu1 %v2835_v36, %s2723_s29 }
 0x11c   : > { %1419 = vrot.lane.b32.xlu0 %v2835_v36, %s2724_s7  ;;  %1417 = vrot.lane.b32.xlu1 %v2830_v35, %s2724_s7 }
 0x120   : > { %1459 = vrot.lane.b32.xlu0 %v2830_v35, %s2725_s8  ;;  %1457 = vrot.lane.b32.xlu1 %v2826_v30, %s2725_s8 }
 0x124   : > { %1331 = vrot.lane.b32.xlu0 %v2826_v30, %s2726_s9  ;;  %1461 = vrot.lane.b32.xlu1 %v2835_v36, %s2725_s8 }
 0x128   : > { %1335 = vrot.lane.b32.xlu0 %v2835_v36, %s2726_s9  ;;  %1333 = vrot.lane.b32.xlu1 %v2830_v35, %s2726_s9 }
 0x12a   : > { %v1018_v42 = vpop.permute.xlu1 %1017 }
 0x12b   : > { %v1025_v46 = vrot.slane %v1018_v42, 4 }
 0x12c   : > { %1375 = vrot.lane.b32.xlu0 %v2830_v35, %s2727_s10  ;;  %1373 = vrot.lane.b32.xlu1 %v2826_v30, %s2727_s10 }
 0x12e   : > { %v2926_v43 = vpop.permute.xlu0 %1021  ;;  %v1020_v44 = vpop.permute.xlu1 %1019 }
 0x12f   : > { %v1027_v45 = vrot.slane %v2926_v43, 4  ;;  %v1026_v47 = vrot.slane %v1020_v44, 4 }
 0x130   : > { %1247 = vrot.lane.b32.xlu0 %v2826_v30, %s3566_s11  ;;  %1377 = vrot.lane.b32.xlu1 %v2835_v36, %s2727_s10 }
 0x131   : > { %v1029_v48 = vsel %vm469_vm3, %v1025_v46, %v1026_v47  ;;  %v1032_v49 = vsel %vm469_vm3, %v1026_v47, %v1027_v45 }
 0x132   : > { %v1056_v50 = vpop.permute.xlu0 %1055  ;;  %v1031_v51 = vsel %vm1030_vm5, %v1018_v42, %v1029_v48  ;;  %v1033_v52 = vsel %vm1030_vm5, %v1020_v44, %v1032_v49  ;;  %v1054_v53 = vpop.permute.xlu1 %1053 }
 0x133   : > { %v1062_v54 = vrot.slane %v1056_v50, 4  ;;  %v1061_v55 = vrot.slane %v1054_v53, 4 }
 0x134   : > { %1251 = vrot.lane.b32.xlu0 %v2835_v36, %s3566_s11  ;;  %1249 = vrot.lane.b32.xlu1 %v2830_v35, %s3566_s11  ;;  %s3570_s11 = smov 39  }
 0x135   : > { %v1065_v56 = vsel %vm469_vm3, %v1061_v55, %v1062_v54 }
 0x136   : > { %v1067_v57 = vsel %vm1066_vm6, %v1054_v53, %v1065_v56  ;;  %v970_v58 = vpop.permute.xlu0 %969  ;;  %v2945_v59 = vpop.permute.xlu1 %1057 }
 0x137   : > { %v1063_v60 = vrot.slane %v2945_v59, 4  ;;  %v2554_v61 = vcombine.high %v1031_v51, %v1067_v57  ;;  %v2553_v62 = vcombine.low %v1031_v51, %v1067_v57  ;;  %v979_v0 = vrot.slane %v970_v58, 4 }
 0x138   : > { %1291 = vrot.lane.b32.xlu0 %v2830_v35, %s3568_s30  ;;  %1289 = vrot.lane.b32.xlu1 %v2826_v30, %s3568_s30 }
 0x139   : > { %v1068_v63 = vsel %vm469_vm3, %v1062_v54, %v1063_v60  ;;  %2220 = vmatprep.subr.bf16.mxu0 %v2554_v61 }
 0x13a   : > { %v1069_v1 = vsel %vm1066_vm6, %v1056_v50, %v1068_v63  ;;  %v2956_v2 = vpop.permute.xlu0 %973  ;;  %v972_v3 = vpop.permute.xlu1 %971  ;;  %2221 = vmatpush1.bf16.msra.mxu0 %v2553_v62  ;;  %v3023_v63 = vld [vmem:[#allocation2 + $0x1c] sm:$0xff] }
 0x13b   : > { %v981_v4 = vrot.slane %v2956_v2, 4  ;;  %v980_v5 = vrot.slane %v972_v3, 4  ;;  %v2556_v6 = vcombine.high %v1033_v52, %v1069_v1  ;;  %v2555_v7 = vcombine.low %v1033_v52, %v1069_v1 }
 0x13c   : > { %1163 = vrot.lane.b32.xlu0 %v2826_v30, %s3570_s11  ;;  %1293 = vrot.lane.b32.xlu1 %v2835_v36, %s3568_s30  ;;  %s3572_s30 = smov 38  }
 0x13d   : > { %v984_v8 = vsel %vm469_vm3, %v979_v0, %v980_v5  ;;  %v987_v9 = vsel %vm469_vm3, %v980_v5, %v981_v4  ;;  %2261 = vmatprep.subr.bf16.mxu1 %v2556_v6 }
 0x13e   : > { %v986_v10 = vsel %vm985_vm7, %v970_v58, %v984_v8  ;;  %v988_v11 = vsel %vm985_vm7, %v972_v3, %v987_v9  ;;  %v888_v12 = vpop.permute.xlu0 %887  ;;  %v886_v13 = vpop.permute.xlu1 %885  ;;  %2262 = vmatpush1.bf16.msra.mxu1 %v2555_v7  ;;  %v3035_v8 = vld [vmem:[#allocation2 + $0x18] sm:$0xff] }
 0x13f   : > { %v896_v14 = vrot.slane %v888_v12, 4  ;;  %v895_v15 = vrot.slane %v886_v13, 4  ;;  %v2546_v16 = vcombine.high %v986_v10, %v2826_v30  ;;  %v2548_v17 = vcombine.high %v988_v11, %v2830_v35 }
 0x140   : > { %1167 = vrot.lane.b32.xlu0 %v2835_v36, %s3570_s11  ;;  %1165 = vrot.lane.b32.xlu1 %v2830_v35, %s3570_s11  ;;  %v2545_v18 = vcombine.low %v986_v10, %v2826_v30  ;;  %v2547_v19 = vcombine.low %v988_v11, %v2830_v35  ;;  %s3574_s11 = smov 118  }
 0x141   : > { %v900_v20 = vsel %vm469_vm3, %v895_v15, %v896_v14  ;;  %2222 = vmatprep.subr.bf16.mxu0 %v2546_v16  ;;  %2263 = vmatprep.subr.bf16.mxu1 %v2548_v17 }
 0x142   : > { %v928_v24 = vpop.permute.xlu0 %927  ;;  %v902_v28 = vsel %vm901_vm8, %v886_v13, %v900_v20  ;;  %v2979_v29 = vpop.permute.xlu1 %889  ;;  %2223 = vmatpush1.bf16.msra.mxu0 %v2545_v18  ;;  %2264 = vmatpush1.bf16.msra.mxu1 %v2547_v19  ;;  %v3044_v13 = vld [vmem:[%s3562_s4] sm:$0xff] }
 0x143   : > { %v897_v21 = vrot.slane %v2979_v29, 4  ;;  %v937_v34 = vrot.slane %v928_v24, 4  ;;  %v3049_v15 = vcombine.high %v3044_v13, %v3044_v13  ;;  %v963_v20 = vld [vmem:[#allocation2 + $0x20] sm:$0xf] }
 0x144   : > { %1207 = vrot.lane.b32.xlu0 %v2830_v35, %s3572_s30  ;;  %1205 = vrot.lane.b32.xlu1 %v2826_v30, %s3572_s30 }
 0x145   : > { %v903_v32 = vsel %vm469_vm3, %v896_v14, %v897_v21  ;;  %2610 = vmatprep.mubr.msk.bf16.mxu0 %vm2192_vm13, %v3049_v15  ;;  %2612 = vmatprep.mubr.msk.bf16.mxu1 %vm2192_vm13, %v3049_v15 }
 0x146   : > { %v2989_v22 = vpop.permute.xlu0 %931  ;;  %v904_v33 = vsel %vm901_vm8, %v888_v12, %v903_v32  ;;  %v930_v23 = vpop.permute.xlu1 %929 }
 0x147   : > { %v939_v25 = vrot.slane %v2989_v22, 4  ;;  %v938_v26 = vrot.slane %v930_v23, 4 }
 0x148   : > { %1089 = vrot.lane.b32.xlu0 %v2826_v30, %s3574_s11  ;;  %1209 = vrot.lane.b32.xlu1 %v2835_v36, %s3572_s30  ;;  %s2733_s30 = smov 117  }
 0x149   : > { %v942_v31 = vsel %vm469_vm3, %v937_v34, %v938_v26  ;;  %v945_v37 = vsel %vm469_vm3, %v938_v26, %v939_v25 }
 0x14a   : > { %v944_v38 = vsel %vm943_vm9, %v928_v24, %v942_v31  ;;  %v946_v39 = vsel %vm943_vm9, %v930_v23, %v945_v37  ;;  %v804_v40 = vpop.permute.xlu0 %803  ;;  %v802_v41 = vpop.permute.xlu1 %801  ;;  %v879_v31 = vld [vmem:[#allocation2 + $0x20] sm:$0xf] }
 0x14b   : > { %v812_v42 = vrot.slane %v804_v40, 4  ;;  %v811_v44 = vrot.slane %v802_v41, 4  ;;  %v2538_v46 = vcombine.high %v902_v28, %v944_v38  ;;  %v2540_v47 = vcombine.high %v904_v33, %v946_v39 }
 0x14c   : > { %1093 = vrot.lane.b32.xlu0 %v2835_v36, %s3574_s11  ;;  %1091 = vrot.lane.b32.xlu1 %v2830_v35, %s3574_s11  ;;  %v2537_v48 = vcombine.low %v902_v28, %v944_v38  ;;  %v2539_v49 = vcombine.low %v904_v33, %v946_v39 }
 0x14d   : > { %v816_v50 = vsel %vm469_vm3, %v811_v44, %v812_v42  ;;  %2224 = vmatprep.subr.bf16.mxu0 %v2538_v46  ;;  %2265 = vmatprep.subr.bf16.mxu1 %v2540_v47  ;;  %v921_v47 = vld [vmem:[#allocation2 + $0x20] sm:$0xf] }
 0x14e   : > { %v844_v51 = vpop.permute.xlu0 %843  ;;  %v818_v52 = vsel %vm817_vm10, %v802_v41, %v816_v50  ;;  %v3009_v53 = vpop.permute.xlu1 %805  ;;  %2225 = vmatpush1.bf16.msra.mxu0 %v2537_v48  ;;  %2266 = vmatpush1.bf16.msra.mxu1 %v2539_v49 }
 0x14f   : > { %v813_v54 = vrot.slane %v3009_v53, 4  ;;  %v853_v61 = vrot.slane %v844_v51, 4 }
 0x150   : > { %1127 = vrot.lane.b32.xlu0 %v2830_v35, %s2733_s30  ;;  %1125 = vrot.lane.b32.xlu1 %v2826_v30, %s2733_s30 }
 0x151   : > { %v819_v55 = vsel %vm469_vm3, %v812_v42, %v813_v54 }
 0x152   : > { %v3019_v56 = vpop.permute.xlu0 %847  ;;  %v820_v57 = vsel %vm817_vm10, %v804_v40, %v819_v55  ;;  %v846_v58 = vpop.permute.xlu1 %845 }
 0x153   : > { %v855_v62 = vrot.slane %v3019_v56, 4  ;;  %v854_v0 = vrot.slane %v846_v58, 4 }
 0x154   : > { %1023 = vrot.lane.b32.xlu0 %v3023_v63, %s2708_s12  ;;  %1129 = vrot.lane.b32.xlu1 %v2835_v36, %s2733_s30 }
 0x155   : > { %v858_v30 = vsel %vm469_vm3, %v853_v61, %v854_v0  ;;  %v861_v35 = vsel %vm469_vm3, %v854_v0, %v855_v62  ;;  %v795_v0 = vld [vmem:[#allocation2 + $0x20] sm:$0xf] }
 0x156   : > { %v860_v1 = vsel %vm859_vm11, %v844_v51, %v858_v30  ;;  %v862_v3 = vsel %vm859_vm11, %v846_v58, %v861_v35  ;;  %v720_v5 = vpop.permute.xlu0 %719  ;;  %v718_v6 = vpop.permute.xlu1 %717 }
 0x157   : > { %v728_v7 = vrot.slane %v720_v5, 4  ;;  %v727_v9 = vrot.slane %v718_v6, 4  ;;  %v2530_v10 = vcombine.high %v818_v52, %v860_v1  ;;  %v2532_v11 = vcombine.high %v820_v57, %v862_v3 }
 0x158   : > { %975 = vrot.lane.b32.xlu0 %v3035_v8, %s2710_s14  ;;  %1059 = vrot.lane.b32.xlu1 %v3023_v63, %s2709_s13  ;;  %v2529_v36 = vcombine.low %v818_v52, %v860_v1  ;;  %v2531_v12 = vcombine.low %v820_v57, %v862_v3  ;;  %s3598_s13 = smov 37  }
 0x159   : > { %v732_v14 = vsel %vm469_vm3, %v727_v9, %v728_v7  ;;  %2226 = vmatprep.subr.bf16.mxu0 %v2530_v10  ;;  %2267 = vmatprep.subr.bf16.mxu1 %v2532_v11  ;;  %v837_v9 = vld [vmem:[#allocation2 + $0x20] sm:$0xf] }
 0x15a   : > { %v760_v16 = vpop.permute.xlu0 %759  ;;  %v734_v17 = vsel %vm733_vm12, %v718_v6, %v732_v14  ;;  %v3052_v18 = vpop.permute.xlu1 %721  ;;  %2227 = vmatpush1.bf16.msra.mxu0 %v2529_v36  ;;  %2268 = vmatpush1.bf16.msra.mxu1 %v2531_v12 }
 0x15b   : > { %v729_v19 = vrot.slane %v3052_v18, 4  ;;  %v769_v23 = vrot.slane %v760_v16, 4 }
 0x15c   : > { %891 = vrot.lane.b32.xlu0 %v3035_v8, %s2711_s15  ;;  %977 = vrot.lane.b32.xlu1 %v963_v20, %s2710_s14  ;;  %s3599_s14 = smov 29  }
 0x15d   : > { %v735_v24 = vsel %vm469_vm3, %v728_v7, %v729_v19 }
 0x15e   : > { %v3065_v28 = vpop.permute.xlu0 %763  ;;  %v736_v32 = vsel %vm733_vm12, %v720_v5, %v735_v24  ;;  %v762_v33 = vpop.permute.xlu1 %761  ;;  %v711_v24 = vld [vmem:[#allocation2 + $0x20] sm:$0xf] }
 0x15f   : > { %v771_v34 = vrot.slane %v3065_v28, 4  ;;  %v770_v26 = vrot.slane %v762_v33, 4 }
 0x160   : > { %933 = vrot.lane.b32.xlu0 %v3035_v8, %s2712_s16  ;;  %893 = vrot.lane.b32.xlu1 %v879_v31, %s2711_s15  ;;  %s3600_s15 = smov 39  }
 0x161   : > { %v774_v37 = vsel %vm469_vm3, %v769_v23, %v770_v26  ;;  %v777_v38 = vsel %vm469_vm3, %v770_v26, %v771_v34 }
 0x162   : > { %v776_v39 = vsel %vm775_vm14, %v760_v16, %v774_v37  ;;  %v778_v40 = vsel %vm775_vm14, %v762_v33, %v777_v38  ;;  %v636_v41 = vpop.permute.xlu0 %635  ;;  %v634_v42 = vpop.permute.xlu1 %633 }
 0x163   : > { %v644_v44 = vrot.slane %v636_v41, 4  ;;  %v643_v46 = vrot.slane %v634_v42, 4  ;;  %v2522_v48 = vcombine.high %v734_v17, %v776_v39  ;;  %v2524_v49 = vcombine.high %v736_v32, %v778_v40 }
 0x164   : > { %807 = vrot.lane.b32.xlu0 %v3035_v8, %s2713_s17  ;;  %935 = vrot.lane.b32.xlu1 %v921_v47, %s2712_s16  ;;  %v2521_v50 = vcombine.low %v734_v17, %v776_v39  ;;  %v2523_v51 = vcombine.low %v736_v32, %v778_v40  ;;  %s3601_s16 = smov 38  }
 0x165   : > { %v648_v52 = vsel %vm469_vm3, %v643_v46, %v644_v44  ;;  %2228 = vmatprep.subr.bf16.mxu0 %v2522_v48  ;;  %2269 = vmatprep.subr.bf16.mxu1 %v2524_v49 }
 0x166   : > { %v676_v55 = vpop.permute.xlu0 %675  ;;  %v650_v57 = vsel %vm649_vm15, %v634_v42, %v648_v52  ;;  %v3083_v58 = vpop.permute.xlu1 %637  ;;  %2229 = vmatpush1.bf16.msra.mxu0 %v2521_v50  ;;  %2270 = vmatpush1.bf16.msra.mxu1 %v2523_v51  ;;  %v627_v51 = vld [vmem:[#allocation2 + $0x20] sm:$0xf] }
 0x167   : > { %v645_v61 = vrot.slane %v3083_v58, 4  ;;  %v685_v5 = vrot.slane %v676_v55, 4 }
 0x168   : > { %849 = vrot.lane.b32.xlu0 %v3035_v8, %s2714_s18  ;;  %809 = vrot.lane.b32.xlu1 %v795_v0, %s2713_s17  ;;  %s3602_s17 = smov 118  }
 0x169   : > { %v651_v30 = vsel %vm469_vm3, %v644_v44, %v645_v61 }
 0x16a   : > { %v3092_v35 = vpop.permute.xlu0 %679  ;;  %v652_v1 = vsel %vm649_vm15, %v636_v41, %v651_v30  ;;  %v678_v3 = vpop.permute.xlu1 %677  ;;  %v753_v41 = vld [vmem:[#allocation2 + $0x20] sm:$0xf] }
 0x16b   : > { %v687_v6 = vrot.slane %v3092_v35, 4  ;;  %v686_v7 = vrot.slane %v678_v3, 4 }
 0x16c   : > { %723 = vrot.lane.b32.xlu0 %v3035_v8, %s2715_s19  ;;  %851 = vrot.lane.b32.xlu1 %v837_v9, %s2714_s18 }
 0x16d   : > { %v690_v10 = vsel %vm469_vm3, %v685_v5, %v686_v7  ;;  %v693_v11 = vsel %vm469_vm3, %v686_v7, %v687_v6  ;;  %v669_v7 = vld [vmem:[#allocation2 + $0x20] sm:$0xf] }
 0x16e   : > { %v692_v36 = vsel %vm691_vm0, %v676_v55, %v690_v10  ;;  %v694_v12 = vsel %vm691_vm0, %v678_v3, %v693_v11  ;;  %v556_v14 = vpop.permute.xlu0 %555  ;;  %v554_v16 = vpop.permute.xlu1 %553 }
 0x16f   : > { %v562_v17 = vrot.slane %v556_v14, 4  ;;  %v561_v20 = vrot.slane %v554_v16, 4  ;;  %v2514_v32 = vcombine.high %v650_v57, %v692_v36  ;;  %v2516_v33 = vcombine.high %v652_v1, %v694_v12 }
 0x170   : > { %765 = vrot.lane.b32.xlu0 %v3035_v8, %s2716_s20  ;;  %725 = vrot.lane.b32.xlu1 %v711_v24, %s2715_s19  ;;  %v2513_v23 = vcombine.low %v650_v57, %v692_v36  ;;  %v2515_v26 = vcombine.low %v652_v1, %v694_v12  ;;  %s3637_s19 = sshll.u32 %s3639_s22, 6 }
 0x171   : > { %v565_v31 = vsel %vm469_vm3, %v561_v20, %v562_v17  ;;  %2230 = vmatprep.subr.bf16.mxu0 %v2514_v32  ;;  %2271 = vmatprep.subr.bf16.mxu1 %v2516_v33  ;;  %v585_v20 = vld [vmem:[#allocation2 + $0x20] sm:$0xf] }
 0x172   : > { %v592_v37 = vpop.permute.xlu0 %591  ;;  %v567_v38 = vsel %vm3575_vm1, %v554_v16, %v565_v31  ;;  %v3110_v39 = vpop.permute.xlu1 %557  ;;  %2231 = vmatpush1.bf16.msra.mxu0 %v2513_v23  ;;  %2272 = vmatpush1.bf16.msra.mxu1 %v2515_v26 }
 0x173   : > { %v563_v40 = vrot.slane %v3110_v39, 4  ;;  %v601_v48 = vrot.slane %v592_v37, 4 }
 0x174   : > { %639 = vrot.lane.b32.xlu0 %v3035_v8, %s2717_s23  ;;  %767 = vrot.lane.b32.xlu1 %v753_v41, %s2716_s20 }
 0x175   : > { %v568_v42 = vsel %vm469_vm3, %v562_v17, %v563_v40 }
 0x176   : > { %v3119_v44 = vpop.permute.xlu0 %595  ;;  %v569_v46 = vsel %vm3575_vm1, %v556_v14, %v568_v42  ;;  %v594_v47 = vpop.permute.xlu1 %593  ;;  %vm3577_vm1 = vcmask 908288  }
 0x177   : > { %v603_v49 = vrot.slane %v3119_v44, 4  ;;  %v602_v50 = vrot.slane %v594_v47, 4 }
 0x178   : > { %681 = vrot.lane.b32.xlu0 %v3035_v8, %s2718_s24  ;;  %641 = vrot.lane.b32.xlu1 %v627_v51, %s2717_s23 }
 0x179   : > { %v606_v52 = vsel %vm469_vm3, %v601_v48, %v602_v50  ;;  %v609_v55 = vsel %vm469_vm3, %v602_v50, %v603_v49 }
 0x17a   : > { %v608_v57 = vsel %vm3576_vm2, %v592_v37, %v606_v52  ;;  %v610_v0 = vsel %vm3576_vm2, %v594_v47, %v609_v55  ;;  %v483_v30 = vpop.permute.xlu0 %482  ;;  %v481_v1 = vpop.permute.xlu1 %480  ;;  %vm3578_vm2 = vcmask 900096  }
 0x17b   : > { %v489_v3 = vrot.slane %v483_v30, 4  ;;  %v488_v5 = vrot.slane %v481_v1, 4  ;;  %v2506_v9 = vcombine.high %v567_v38, %v608_v57  ;;  %v2508_v10 = vcombine.high %v569_v46, %v610_v0 }
 0x17c   : > { %559 = vrot.lane.b32.xlu0 %v3035_v8, %s2719_s25  ;;  %683 = vrot.lane.b32.xlu1 %v669_v7, %s2718_s24  ;;  %v2505_v11 = vcombine.low %v567_v38, %v608_v57  ;;  %v2507_v36 = vcombine.low %v569_v46, %v610_v0  ;;  %v1493_v46 = vld [vmem:[#allocation2 + $0x24] sm:$0xf]  ;;  %s3545_s24 = scalar_lea.vmem %s3564_s6, %s3637_s19 }
 0x17d   : > { %v493_v12 = vsel %vm469_vm3, %v488_v5, %v489_v3  ;;  %2232 = vmatprep.subr.bf16.mxu0 %v2506_v9  ;;  %2273 = vmatprep.subr.bf16.mxu1 %v2508_v10 }
 0x17e   : > { %v518_v14 = vpop.permute.xlu0 %517  ;;  %v495_v16 = vsel %vm3577_vm1, %v481_v1, %v493_v12  ;;  %v3137_v17 = vpop.permute.xlu1 %484  ;;  %2233 = vmatpush1.bf16.msra.mxu0 %v2505_v11  ;;  %2274 = vmatpush1.bf16.msra.mxu1 %v2507_v36 }
 0x17f   : > { %v490_v24 = vrot.slane %v3137_v17, 4  ;;  %v525_v31 = vrot.slane %v518_v14, 4 }
 0x180   : > { %599 = vrot.lane.b32.xlu0 %v585_v20, %s2720_s26  ;;  %597 = vrot.lane.b32.xlu1 %v3035_v8, %s2720_s26 }
 0x181   : > { %v496_v32 = vsel %vm469_vm3, %v489_v3, %v490_v24  ;;  %v1409_v3 = vld [vmem:[#allocation2 + $0x24] sm:$0xf] }
 0x182   : > { %v3146_v33 = vpop.permute.xlu0 %521  ;;  %v497_v23 = vsel %vm3577_vm1, %v483_v30, %v496_v32  ;;  %v520_v26 = vpop.permute.xlu1 %519  ;;  %vm3579_vm1 = vcmask 138240  }
 0x183   : > { %v527_v37 = vrot.slane %v3146_v33, 4  ;;  %v526_v38 = vrot.slane %v520_v26, 4 }
 0x184   : > { %523 = vrot.lane.b32.xlu0 %v3035_v8, %s2722_s28  ;;  %486 = vrot.lane.b32.xlu1 %v3035_v8, %s2721_s27 }
 0x185   : > { %v529_v41 = vsel %vm469_vm3, %v525_v31, %v526_v38  ;;  %v532_v42 = vsel %vm469_vm3, %v526_v38, %v527_v37 }
 0x186   : > { %v1502_v47 = vpop.permute.xlu0 %1501  ;;  %v531_v48 = vsel %vm3578_vm2, %v518_v14, %v529_v41  ;;  %v533_v50 = vsel %vm3578_vm2, %v520_v26, %v532_v42  ;;  %v1500_v51 = vpop.permute.xlu1 %1499  ;;  %v1451_v14 = vld [vmem:[#allocation2 + $0x24] sm:$0xf]  ;;  %vm3580_vm2 = vcmask 154624  }
 0x187   : > { %v1510_v52 = vrot.slane %v1502_v47, 4  ;;  %v1509_v55 = vrot.slane %v1500_v51, 4  ;;  %v2498_v57 = vcombine.high %v495_v16, %v531_v48  ;;  %v2500_v0 = vcombine.high %v497_v23, %v533_v50 }
 0x188   : > { %1507 = vrot.lane.b32.xlu0 %v1493_v46, %s2723_s29  ;;  %1505 = vrot.lane.b32.xlu1 %v3023_v63, %s2723_s29  ;;  %v2497_v8 = vcombine.low %v495_v16, %v531_v48  ;;  %v2499_v30 = vcombine.low %v497_v23, %v533_v50 }
 0x189   : > { %v1514_v1 = vsel %vm469_vm3, %v1509_v55, %v1510_v52  ;;  %2234 = vmatprep.subr.bf16.mxu0 %v2498_v57  ;;  %2275 = vmatprep.subr.bf16.mxu1 %v2500_v0 }
 0x18a   : > { %v1416_v5 = vpop.permute.xlu0 %1415  ;;  %v1516_v7 = vsel %vm3579_vm1, %v1500_v51, %v1514_v1  ;;  %v3165_v9 = vpop.permute.xlu1 %1503  ;;  %2235 = vmatpush1.bf16.msra.mxu0 %v2497_v8  ;;  %2276 = vmatpush1.bf16.msra.mxu1 %v2499_v30  ;;  %v1367_v1 = vld [vmem:[#allocation2 + $0x24] sm:$0xf] }
 0x18b   : > { %v1511_v10 = vrot.slane %v3165_v9, 4  ;;  %v2602_v11 = vcombine.high %v1516_v7, %v1516_v7  ;;  %v2601_v36 = vcombine.low %v1516_v7, %v1516_v7  ;;  %v1425_v20 = vrot.slane %v1416_v5, 4 }
 0x18c   : > { %1423 = vrot.lane.b32.xlu0 %v1409_v3, %s2724_s7  ;;  %1421 = vrot.lane.b32.xlu1 %v3023_v63, %s2724_s7 }
 0x18d   : > { %v1517_v12 = vsel %vm469_vm3, %v1510_v52, %v1511_v10  ;;  %2609 = vmatprep.subr.msk.bf16.mxu0 %vm469_vm3, %v2602_v11  ;;  %v2197_v16 = vsel %vm469_vm3, %v2601_v36, 0 }
 0x18e   : > { %v3176_v32 = vpop.permute.xlu0 %1419  ;;  %v1518_v23 = vsel %vm3579_vm1, %v1502_v47, %v1517_v12  ;;  %v1418_v26 = vpop.permute.xlu1 %1417  ;;  %2241 = vmatpush2.bf16.msra.mxu0 %v2197_v16  ;;  %v1325_v47 = vld [vmem:[#allocation2 + $0x24] sm:$0xf]  ;;  %vm3581_vm1 = vcmask 146432  }
 0x18f   : > { %v1427_v31 = vrot.slane %v3176_v32, 4  ;;  %v1426_v38 = vrot.slane %v1418_v26, 4  ;;  %v2604_v41 = vcombine.high %v1518_v23, %v1518_v23  ;;  %v2603_v42 = vcombine.low %v1518_v23, %v1518_v23  ;;  %v1241_v16 = vld [vmem:[#allocation2 + $0x24] sm:$0xf] }
 0x190   : > { %1465 = vrot.lane.b32.xlu0 %v1451_v14, %s2725_s8  ;;  %1463 = vrot.lane.b32.xlu1 %v3023_v63, %s2725_s8 }
 0x191   : > { %v1430_v46 = vsel %vm469_vm3, %v1425_v20, %v1426_v38  ;;  %v1433_v48 = vsel %vm469_vm3, %v1426_v38, %v1427_v31  ;;  %2611 = vmatprep.subr.msk.bf16.mxu1 %vm469_vm3, %v2604_v41  ;;  %v2203_v50 = vsel %vm469_vm3, %v2603_v42, 0 }
 0x192   : > { %v1460_v51 = vpop.permute.xlu0 %1459  ;;  %v1432_v52 = vsel %vm3580_vm2, %v1416_v5, %v1430_v46  ;;  %v1434_v55 = vsel %vm3580_vm2, %v1418_v26, %v1433_v48  ;;  %v1458_v57 = vpop.permute.xlu1 %1457  ;;  %2282 = vmatpush2.bf16.msra.mxu1 %v2203_v50  ;;  %vm3582_vm2 = vcmask 228352  }
 0x193   : > { %v1468_v0 = vrot.slane %v1460_v51, 4  ;;  %v1467_v8 = vrot.slane %v1458_v57, 4 }
 0x194   : > { %1339 = vrot.lane.b32.xlu0 %v1325_v47, %s2726_s9  ;;  %1337 = vrot.lane.b32.xlu1 %v3023_v63, %s2726_s9 }
 0x195   : > { %v1472_v30 = vsel %vm469_vm3, %v1467_v8, %v1468_v0 }
 0x196   : > { %v1332_v3 = vpop.permute.xlu0 %1331  ;;  %v1474_v7 = vsel %vm3581_vm1, %v1458_v57, %v1472_v30  ;;  %v3196_v11 = vpop.permute.xlu1 %1461 }
 0x197   : > { %v3594_v5 = vrot.slane %v3196_v11, 4  ;;  %v2594_v36 = vcombine.high %v1432_v52, %v1474_v7  ;;  %v2593_v12 = vcombine.low %v1432_v52, %v1474_v7  ;;  %v1341_v20 = vrot.slane %v1332_v3, 4  ;;  %v1157_v7 = vld [vmem:[#allocation2 + $0x24] sm:$0xf] }
 0x198   : > { %1381 = vrot.lane.b32.xlu0 %v1367_v1, %s2727_s10  ;;  %1379 = vrot.lane.b32.xlu1 %v3023_v63, %s2727_s10 }
 0x199   : > { %v1475_v14 = vsel %vm469_vm3, %v1468_v0, %v3594_v5  ;;  %2242 = vmatprep.subr.bf16.mxu0 %v2594_v36 }
 0x19a   : > { %v3205_v23 = vpop.permute.xlu0 %1335  ;;  %v1476_v26 = vsel %vm3581_vm1, %v1460_v51, %v1475_v14  ;;  %v1334_v38 = vpop.permute.xlu1 %1333  ;;  %2243 = vmatpush2.bf16.msra.mxu0 %v2593_v12  ;;  %v1283_v51 = vld [vmem:[#allocation2 + $0x24] sm:$0xf]  ;;  %vm3583_vm1 = vcmask 220160  }
 0x19b   : > { %v3593_v41 = vrot.slane %v3205_v23, 4  ;;  %v1342_v42 = vrot.slane %v1334_v38, 4  ;;  %v2596_v46 = vcombine.high %v1434_v55, %v1476_v26  ;;  %v2595_v48 = vcombine.low %v1434_v55, %v1476_v26 }
 0x19c   : > { %1255 = vrot.lane.b32.xlu0 %v1241_v16, %s3598_s13  ;;  %1253 = vrot.lane.b32.xlu1 %v3023_v63, %s3598_s13 }
 0x19d   : > { %v1346_v47 = vsel %vm469_vm3, %v1341_v20, %v1342_v42  ;;  %v1349_v50 = vsel %vm469_vm3, %v1342_v42, %v3593_v41  ;;  %2283 = vmatprep.subr.bf16.mxu1 %v2596_v46 }
 0x19e   : > { %v1376_v52 = vpop.permute.xlu0 %1375  ;;  %v1348_v57 = vsel %vm3582_vm2, %v1332_v3, %v1346_v47  ;;  %v1350_v0 = vsel %vm3582_vm2, %v1334_v38, %v1349_v50  ;;  %v1374_v8 = vpop.permute.xlu1 %1373  ;;  %2284 = vmatpush2.bf16.msra.mxu1 %v2595_v48  ;;  %v1199_v38 = vld [vmem:[#allocation2 + $0x24] sm:$0xf]  ;;  %vm3584_vm2 = vcmask 302080  }
 0x19f   : > { %v1384_v55 = vrot.slane %v1376_v52, 4  ;;  %v1383_v30 = vrot.slane %v1374_v8, 4 }
 0x1a0   : > { %1297 = vrot.lane.b32.xlu0 %v1283_v51, %s3599_s14  ;;  %1295 = vrot.lane.b32.xlu1 %v3023_v63, %s3599_s14 }
 0x1a1   : > { %v1388_v1 = vsel %vm469_vm3, %v1383_v30, %v1384_v55 }
 0x1a2   : > { %v1248_v36 = vpop.permute.xlu0 %1247  ;;  %v1390_v12 = vsel %vm3583_vm1, %v1374_v8, %v1388_v1  ;;  %v3223_v14 = vpop.permute.xlu1 %1377 }
 0x1a3   : > { %v3590_v3 = vrot.slane %v3223_v14, 4  ;;  %v2586_v16 = vcombine.high %v1348_v57, %v1390_v12  ;;  %v2585_v20 = vcombine.low %v1348_v57, %v1390_v12  ;;  %v1257_v42 = vrot.slane %v1248_v36, 4 }
 0x1a4   : > { %1171 = vrot.lane.b32.xlu0 %v1157_v7, %s3600_s15  ;;  %1169 = vrot.lane.b32.xlu1 %v3023_v63, %s3600_s15 }
 0x1a5   : > { %v1391_v26 = vsel %vm469_vm3, %v1384_v55, %v3590_v3  ;;  %2244 = vmatprep.subr.bf16.mxu0 %v2586_v16 }
 0x1a6   : > { %v3232_v46 = vpop.permute.xlu0 %1251  ;;  %v1392_v48 = vsel %vm3583_vm1, %v1376_v52, %v1391_v26  ;;  %v1250_v47 = vpop.permute.xlu1 %1249  ;;  %2245 = vmatpush2.bf16.msra.mxu0 %v2585_v20  ;;  %vm3586_vm1 = vcmask 236544  }
 0x1a7   : > { %v3587_v50 = vrot.slane %v3232_v46, 4  ;;  %v1258_v51 = vrot.slane %v1250_v47, 4  ;;  %v2588_v57 = vcombine.high %v1350_v0, %v1392_v48  ;;  %v2587_v8 = vcombine.low %v1350_v0, %v1392_v48 }
 0x1a8   : > { %1213 = vrot.lane.b32.xlu0 %v1199_v38, %s3601_s16  ;;  %1211 = vrot.lane.b32.xlu1 %v3023_v63, %s3601_s16 }
 0x1a9   : > { %v1262_v55 = vsel %vm469_vm3, %v1257_v42, %v1258_v51  ;;  %v1265_v30 = vsel %vm469_vm3, %v1258_v51, %v3587_v50  ;;  %2285 = vmatprep.subr.bf16.mxu1 %v2588_v57 }
 0x1aa   : > { %v1292_v52 = vpop.permute.xlu0 %1291  ;;  %v1264_v1 = vsel %vm3584_vm2, %v1248_v36, %v1262_v55  ;;  %v1266_v7 = vsel %vm3584_vm2, %v1250_v47, %v1265_v30  ;;  %v1290_v12 = vpop.permute.xlu1 %1289  ;;  %2286 = vmatpush2.bf16.msra.mxu1 %v2587_v8  ;;  %vm3589_vm2 = vcmask 318464  }
 0x1ab   : > { %v1300_v0 = vrot.slane %v1292_v52, 4  ;;  %v1299_v16 = vrot.slane %v1290_v12, 4 }
 0x1ac   : > { %1131 = vrot.lane.b32.xlu0 %v3023_v63, %s2733_s30  ;;  %1095 = vrot.lane.b32.xlu1 %v3023_v63, %s3602_s17  ;;  %v1640_v63 = vld [vmem:[%s3563_s5] sm:$0xff] }
 0x1ad   : > { %v1304_v20 = vsel %vm469_vm3, %v1299_v16, %v1300_v0 }
 0x1ae   : > { %v1164_v26 = vpop.permute.xlu0 %1163  ;;  %v1306_v38 = vsel %vm3586_vm1, %v1290_v12, %v1304_v20  ;;  %v3251_v42 = vpop.permute.xlu1 %1293 }
 0x1af   : > { %v3585_v36 = vrot.slane %v3251_v42, 4  ;;  %v2578_v48 = vcombine.high %v1264_v1, %v1306_v38  ;;  %v2577_v47 = vcombine.low %v1264_v1, %v1306_v38  ;;  %v1173_v57 = vrot.slane %v1164_v26, 4 }
 0x1b0   : > { %1643 = vperm.xlu1 %2661, %v1640_v63  }
 0x1b1   : > { %v1307_v51 = vsel %vm469_vm3, %v1300_v0, %v3585_v36  ;;  %2246 = vmatprep.subr.bf16.mxu0 %v2578_v48 }
 0x1b2   : > { %v3260_v8 = vpop.permute.xlu0 %1167  ;;  %v1308_v55 = vsel %vm3586_vm1, %v1292_v52, %v1307_v51  ;;  %v1166_v30 = vpop.permute.xlu1 %1165  ;;  %2247 = vmatpush2.bf16.msra.mxu0 %v2577_v47  ;;  %vm3591_vm1 = vcmask 310272  }
 0x1b3   : > { %v3588_v1 = vrot.slane %v3260_v8, 4  ;;  %v1174_v12 = vrot.slane %v1166_v30, 4  ;;  %v2580_v16 = vcombine.high %v1266_v7, %v1308_v55  ;;  %v2579_v20 = vcombine.low %v1266_v7, %v1308_v55 }
 0x1b5   : > { %v1178_v0 = vsel %vm469_vm3, %v1173_v57, %v1174_v12  ;;  %v1181_v38 = vsel %vm469_vm3, %v1174_v12, %v3588_v1  ;;  %2287 = vmatprep.subr.bf16.mxu1 %v2580_v16 }
 0x1b6   : > { %v1208_v48 = vpop.permute.xlu0 %1207  ;;  %v1180_v36 = vsel %vm3589_vm2, %v1164_v26, %v1178_v0  ;;  %v1182_v52 = vsel %vm3589_vm2, %v1166_v30, %v1181_v38  ;;  %v1206_v51 = vpop.permute.xlu1 %1205  ;;  %2288 = vmatpush2.bf16.msra.mxu1 %v2579_v20  ;;  %vm1102_vm2 = vcmask 965632  }
 0x1b7   : > { %v1216_v47 = vrot.slane %v1208_v48, 4  ;;  %v1215_v63 = vrot.slane %v1206_v51, 4 }
 0x1b9   : > { %v1220_v50 = vsel %vm469_vm3, %v1215_v63, %v1216_v47 }
 0x1ba   : > { %v1090_v7 = vpop.permute.xlu0 %1089  ;;  %v1222_v57 = vsel %vm3591_vm1, %v1206_v51, %v1220_v50  ;;  %v3272_v55 = vpop.permute.xlu1 %1209 }
 0x1bb   : > { %v3592_v12 = vrot.slane %v3272_v55, 4  ;;  %v2570_v16 = vcombine.high %v1180_v36, %v1222_v57  ;;  %v2569_v1 = vcombine.low %v1180_v36, %v1222_v57  ;;  %v1097_v30 = vrot.slane %v1090_v7, 4 }
 0x1bd   : > { %v1223_v26 = vsel %vm469_vm3, %v1216_v47, %v3592_v12  ;;  %2248 = vmatprep.subr.bf16.mxu0 %v2570_v16 }
 0x1be   : > { %v3278_v20 = vpop.permute.xlu0 %1093  ;;  %v1224_v0 = vsel %vm3591_vm1, %v1208_v48, %v1223_v26  ;;  %v1092_v38 = vpop.permute.xlu1 %1091  ;;  %2249 = vmatpush2.bf16.msra.mxu0 %v2569_v1  ;;  %vm1138_vm1 = vcmask 957440  }
 0x1bf   : > { %v3595_v50 = vrot.slane %v3278_v20, 4  ;;  %v1098_v51 = vrot.slane %v1092_v38, 4  ;;  %v2572_v63 = vcombine.high %v1182_v52, %v1224_v0  ;;  %v2571_v3 = vcombine.low %v1182_v52, %v1224_v0 }
 0x1c1   : > { %v1101_v36 = vsel %vm469_vm3, %v1097_v30, %v1098_v51  ;;  %v1104_v47 = vsel %vm469_vm3, %v1098_v51, %v3595_v50  ;;  %2289 = vmatprep.subr.bf16.mxu1 %v2572_v63 }
 0x1c2   : > { %v1128_v57 = vpop.permute.xlu0 %1127  ;;  %v1103_v16 = vsel %vm1102_vm2, %v1090_v7, %v1101_v36  ;;  %v1105_v48 = vsel %vm1102_vm2, %v1092_v38, %v1104_v47  ;;  %v1126_v26 = vpop.permute.xlu1 %1125  ;;  %2290 = vmatpush2.bf16.msra.mxu1 %v2571_v3 }
 0x1c3   : > { %v1134_v1 = vrot.slane %v1128_v57, 4  ;;  %v1133_v12 = vrot.slane %v1126_v26, 4 }
 0x1c5   : > { %v1137_v41 = vsel %vm469_vm3, %v1133_v12, %v1134_v1 }
 0x1c6   : > { %v1024_v52 = vpop.permute.xlu0 %1023  ;;  %v1139_v30 = vsel %vm1138_vm1, %v1126_v26, %v1137_v41  ;;  %v3290_v0 = vpop.permute.xlu1 %1129  ;;  %v3302_v41 = vcombine.low %v3044_v13, %v3044_v13 }
 0x1c7   : > { %v1028_v5 = vrot.slane %v1024_v52, 4  ;;  %v1135_v51 = vrot.slane %v3290_v0, 4  ;;  %v2562_v63 = vcombine.high %v1103_v16, %v1139_v30  ;;  %v2561_v50 = vcombine.low %v1103_v16, %v1139_v30 }
 0x1c9   : > { %v1034_v7 = vsel %vm469_vm3, %v1027_v45, %v1028_v5  ;;  %v1036_v3 = vsel %vm1030_vm5, %v1024_v52, %v1028_v5  ;;  %v1140_v12 = vsel %vm469_vm3, %v1134_v1, %v1135_v51  ;;  %2250 = vmatprep.subr.bf16.mxu0 %v2562_v63 }
 0x1ca   : > { %v1035_v38 = vsel %vm1030_vm5, %v2926_v43, %v1034_v7  ;;  %1044 = vst.msk [vmem:[#allocation3 + $0x1d8] sm:$0xff] %vm2840_vm4, %v1036_v3  ;;  %v976_v36 = vpop.permute.xlu0 %975  ;;  %v1141_v45 = vsel %vm1138_vm1, %v1128_v57, %v1140_v12  ;;  %v1060_v47 = vpop.permute.xlu1 %1059  ;;  %2251 = vmatpush2.bf16.msra.mxu0 %v2561_v50  ;;  %vm3603_vm5 = vcmask 891904  }
 0x1cb   : > { %v982_v5 = vrot.slane %v976_v36, 4  ;;  %v1064_v16 = vrot.slane %v1060_v47, 4  ;;  %v2564_v26 = vcombine.high %v1105_v48, %v1141_v45  ;;  %v2563_v1 = vcombine.low %v1105_v48, %v1141_v45 }
 0x1cd   : > { %v989_v13 = vsel %vm469_vm3, %v981_v4, %v982_v5  ;;  %v1070_v43 = vsel %vm469_vm3, %v1063_v60, %v1064_v16  ;;  %v1072_v52 = vsel %vm1066_vm6, %v1060_v47, %v1064_v16  ;;  %2291 = vmatprep.subr.bf16.mxu1 %v2564_v26  ;;  %2253 = vmatmul.mubr.bf16.vlgmr.msra.gmra.mxu0 %v3302_v41 }
 0x1ce   : > { %v990_v50 = vsel %vm985_vm7, %v2956_v2, %v989_v13  ;;  %v892_v57 = vpop.permute.xlu0 %891  ;;  %v1071_v48 = vsel %vm1066_vm6, %v2945_v59, %v1070_v43  ;;  %1080 = vst.msk [vmem:[#allocation3 + $0x1f8] sm:$0xff] %vm2840_vm4, %v1072_v52  ;;  %v978_v4 = vpop.permute.xlu1 %977  ;;  %2292 = vmatpush2.bf16.msra.mxu1 %v2563_v1  ;;  %2614 = vmatprep.mubr.msk.bf16.mxu0 %vm2192_vm13, %v3049_v15  ;;  %v2698_v59 = vld [vmem:[#allocation3 + $0x1b0] sm:$0xff]  ;;  %vm3604_vm6 = vmmov %vm3603_vm5 }
 0x1cf   : > { %v898_v60 = vrot.slane %v892_v57, 4  ;;  %v983_v30 = vrot.slane %v978_v4, 4  ;;  %v2557_v63 = vcombine.low %v1035_v38, %v1071_v48  ;;  %v2558_v7 = vcombine.high %v1035_v38, %v1071_v48 }
 0x1d0   : > { %v2550_v12 = vcombine.high %v990_v50, %v2698_v59 }
 0x1d1   : > { %v905_v2 = vsel %vm469_vm3, %v897_v21, %v898_v60  ;;  %v991_v3 = vsel %vm469_vm3, %v982_v5, %v983_v30  ;;  %2302 = vmatprep.subr.bf16.mxu0 %v2558_v7  ;;  %2294 = vmatmul.mubr.bf16.vlgmr.msra.gmra.mxu1 %v3302_v41  ;;  %v2549_v5 = vcombine.low %v990_v50, %v2698_v59  ;;  %v1591_v13 = vld [vmem:[#allocation3 + $0x1d8] sm:$0xff] }
 0x1d2   : > { %v906_v45 = vsel %vm901_vm8, %v2979_v29, %v905_v2  ;;  %v934_v47 = vpop.permute.xlu0 %933  ;;  %v992_v16 = vsel %vm985_vm7, %v976_v36, %v991_v3  ;;  %v894_v26 = vpop.permute.xlu1 %893  ;;  %2303 = vmatpush1.bf16.msra.mxu0 %v2557_v63  ;;  %2616 = vmatprep.mubr.msk.bf16.mxu1 %vm2192_vm13, %v3049_v15  ;;  %vm3605_vm7 = vcmask 826368   ;;  %vm3611_vm13 = vcmask 138240  }
 0x1d3   : > { %v940_v38 = vrot.slane %v934_v47, 4  ;;  %1000 = vst.msk [vmem:[#allocation3 + $0x198] sm:$0xff] %vm2840_vm4, %v992_v16  ;;  %v899_v21 = vrot.slane %v894_v26, 4  ;;  %2304 = vmatprep.subr.bf16.mxu0 %v2550_v12  ;;  %v1587_v16 = vld [vmem:[#allocation3 + $0x1b8] sm:$0xff] }
 0x1d5   : > { %v947_v1 = vsel %vm469_vm3, %v939_v25, %v940_v38  ;;  %v907_v29 = vsel %vm469_vm3, %v898_v60, %v899_v21  ;;  %v1595_v36 = vld [vmem:[#allocation3 + $0x1f8] sm:$0xff] }
 0x1d6   : > { %v948_v43 = vsel %vm943_vm9, %v2989_v22, %v947_v1  ;;  %v808_v52 = vpop.permute.xlu0 %807  ;;  %v908_v15 = vsel %vm901_vm8, %v892_v57, %v907_v29  ;;  %v936_v48 = vpop.permute.xlu1 %935  ;;  %v2559_v4 = vcombine.low %v1591_v13, %v1595_v36  ;;  %v2560_v30 = vcombine.high %v1591_v13, %v1595_v36  ;;  %2305 = vmatpush1.bf16.msra.mxu0 %v2549_v5  ;;  %vm3606_vm8 = vmmov %vm3605_vm7 }
 0x1d7   : > { %v814_v63 = vrot.slane %v808_v52, 4  ;;  %916 = vst.msk [vmem:[#allocation3 + $0x158] sm:$0xff] %vm2840_vm4, %v908_v15  ;;  %v941_v50 = vrot.slane %v936_v48, 4  ;;  %v2542_v25 = vcombine.high %v906_v45, %v948_v43  ;;  %v2541_v60 = vcombine.low %v906_v45, %v948_v43 }
 0x1d8   : > { %2343 = vmatprep.subr.bf16.mxu1 %v2560_v30 }
 0x1d9   : > { %v821_v7 = vsel %vm469_vm3, %v813_v54, %v814_v63  ;;  %v949_v22 = vsel %vm469_vm3, %v940_v38, %v941_v50  ;;  %2344 = vmatpush1.bf16.msra.mxu1 %v2559_v4  ;;  %2306 = vmatprep.subr.bf16.mxu0 %v2542_v25 }
 0x1da   : > { %v822_v57 = vsel %vm817_vm10, %v3009_v53, %v821_v7  ;;  %v850_v2 = vpop.permute.xlu0 %849  ;;  %v950_v3 = vsel %vm943_vm9, %v934_v47, %v949_v22  ;;  %v810_v59 = vpop.permute.xlu1 %809  ;;  %v1583_v12 = vld [vmem:[#allocation3 + $0x198] sm:$0xff]  ;;  %2307 = vmatpush1.bf16.msra.mxu0 %v2541_v60  ;;  %vm3607_vm9 = vcmask 900096  }
 0x1db   : > { %v856_v26 = vrot.slane %v850_v2, 4  ;;  %958 = vst.msk [vmem:[#allocation3 + $0x178] sm:$0xff] %vm2840_vm4, %v950_v3  ;;  %v815_v45 = vrot.slane %v810_v59, 4  ;;  %v2551_v54 = vcombine.low %v1583_v12, %v1587_v16  ;;  %v2552_v21 = vcombine.high %v1583_v12, %v1587_v16 }
 0x1dd   : > { %v863_v38 = vsel %vm469_vm3, %v855_v62, %v856_v26  ;;  %v823_v53 = vsel %vm469_vm3, %v814_v63, %v815_v45  ;;  %2345 = vmatprep.subr.bf16.mxu1 %v2552_v21 }
 0x1de   : > { %v864_v47 = vsel %vm859_vm11, %v3019_v56, %v863_v38  ;;  %v724_v5 = vpop.permute.xlu0 %723  ;;  %v824_v1 = vsel %vm817_vm10, %v808_v52, %v823_v53  ;;  %2346 = vmatpush1.bf16.msra.mxu1 %v2551_v54  ;;  %v852_v29 = vpop.permute.xlu1 %851  ;;  %v1575_v63 = vld [vmem:[#allocation3 + $0x158] sm:$0xff]  ;;  %vm3608_vm10 = vcmask 908288  }
 0x1df   : > { %v730_v13 = vrot.slane %v724_v5, 4  ;;  %832 = vst.msk [vmem:[#allocation3 + $0x118] sm:$0xff] %vm2840_vm4, %v824_v1  ;;  %v857_v36 = vrot.slane %v852_v29, 4  ;;  %v2533_v43 = vcombine.low %v822_v57, %v864_v47  ;;  %v2534_v15 = vcombine.high %v822_v57, %v864_v47 }
 0x1e1   : > { %v737_v62 = vsel %vm469_vm3, %v729_v19, %v730_v13  ;;  %v865_v48 = vsel %vm469_vm3, %v856_v26, %v857_v36  ;;  %2308 = vmatprep.subr.bf16.mxu0 %v2534_v15 }
 0x1e2   : > { %v738_v56 = vsel %vm733_vm12, %v3052_v18, %v737_v62  ;;  %v766_v52 = vpop.permute.xlu0 %765  ;;  %v866_v4 = vsel %vm859_vm11, %v850_v2, %v865_v48  ;;  %v726_v30 = vpop.permute.xlu1 %725  ;;  %v1579_v50 = vld [vmem:[#allocation3 + $0x178] sm:$0xff]  ;;  %2309 = vmatpush1.bf16.msra.mxu0 %v2533_v43  ;;  %vm3609_vm11 = vmmov %vm3607_vm9 }
 0x1e3   : > { %v772_v25 = vrot.slane %v766_v52, 4  ;;  %874 = vst.msk [vmem:[#allocation3 + $0x138] sm:$0xff] %vm2840_vm4, %v866_v4  ;;  %v731_v60 = vrot.slane %v726_v30, 4  ;;  %v2543_v7 = vcombine.low %v1575_v63, %v1579_v50  ;;  %v2544_v19 = vcombine.high %v1575_v63, %v1579_v50 }
 0x1e5   : > { %v779_v22 = vsel %vm469_vm3, %v771_v34, %v772_v25  ;;  %v739_v18 = vsel %vm469_vm3, %v730_v13, %v731_v60  ;;  %2347 = vmatprep.subr.bf16.mxu1 %v2544_v19 }
 0x1e6   : > { %v780_v57 = vsel %vm775_vm14, %v3065_v28, %v779_v22  ;;  %v640_v2 = vpop.permute.xlu0 %639  ;;  %v740_v3 = vsel %vm733_vm12, %v724_v5, %v739_v18  ;;  %2348 = vmatpush1.bf16.msra.mxu1 %v2543_v7  ;;  %v768_v59 = vpop.permute.xlu1 %767  ;;  %v1567_v47 = vld [vmem:[#allocation3 + $0x118] sm:$0xff]  ;;  %vm3610_vm12 = vmmov %vm3608_vm10 }
 0x1e7   : > { %v646_v12 = vrot.slane %v640_v2, 4  ;;  %748 = vst.msk [vmem:[#allocation3 + $0xd8] sm:$0xff] %vm2840_vm4, %v740_v3  ;;  %v773_v16 = vrot.slane %v768_v59, 4  ;;  %v2525_v26 = vcombine.low %v738_v56, %v780_v57  ;;  %v2526_v45 = vcombine.high %v738_v56, %v780_v57 }
 0x1e9   : > { %v653_v34 = vsel %vm469_vm3, %v645_v61, %v646_v12  ;;  %v781_v54 = vsel %vm469_vm3, %v772_v25, %v773_v16  ;;  %2310 = vmatprep.subr.bf16.mxu0 %v2526_v45 }
 0x1ea   : > { %v654_v28 = vsel %vm649_vm15, %v3083_v58, %v653_v34  ;;  %v682_v21 = vpop.permute.xlu0 %681  ;;  %v782_v38 = vsel %vm775_vm14, %v766_v52, %v781_v54  ;;  %v642_v53 = vpop.permute.xlu1 %641  ;;  %v1571_v5 = vld [vmem:[#allocation3 + $0x138] sm:$0xff]  ;;  %2311 = vmatpush1.bf16.msra.mxu0 %v2525_v26  ;;  %vm3612_vm14 = vmmov %vm3611_vm13 }
 0x1eb   : > { %v688_v1 = vrot.slane %v682_v21, 4  ;;  %790 = vst.msk [vmem:[#allocation3 + $0xf8] sm:$0xff] %vm2840_vm4, %v782_v38  ;;  %v647_v29 = vrot.slane %v642_v53, 4  ;;  %v2535_v13 = vcombine.low %v1567_v47, %v1571_v5  ;;  %v2536_v61 = vcombine.high %v1567_v47, %v1571_v5 }
 0x1ed   : > { %v695_v36 = vsel %vm469_vm3, %v687_v6, %v688_v1  ;;  %v655_v58 = vsel %vm469_vm3, %v646_v12, %v647_v29  ;;  %2349 = vmatprep.subr.bf16.mxu1 %v2536_v61 }
 0x1ee   : > { %v696_v43 = vsel %vm691_vm0, %v3092_v35, %v695_v36  ;;  %v560_v15 = vpop.permute.xlu0 %559  ;;  %v656_v62 = vsel %vm649_vm15, %v640_v2, %v655_v58  ;;  %2350 = vmatpush1.bf16.msra.mxu1 %v2535_v13  ;;  %v684_v48 = vpop.permute.xlu1 %683  ;;  %v1559_v19 = vld [vmem:[#allocation3 + $0xd8] sm:$0xff]  ;;  %vm3613_vm15 = vcmask 154624  }
 0x1ef   : > { %v564_v56 = vrot.slane %v560_v15, 4  ;;  %664 = vst.msk [vmem:[#allocation3 + $0x98] sm:$0xff] %vm2840_vm4, %v656_v62  ;;  %v689_v52 = vrot.slane %v684_v48, 4  ;;  %v2517_v4 = vcombine.low %v654_v28, %v696_v43  ;;  %v2518_v30 = vcombine.high %v654_v28, %v696_v43 }
 0x1f1   : > { %v570_v6 = vsel %vm469_vm3, %v563_v40, %v564_v56  ;;  %v572_v63 = vsel %vm3603_vm5, %v560_v15, %v564_v56  ;;  %v697_v35 = vsel %vm469_vm3, %v688_v1, %v689_v52  ;;  %2312 = vmatprep.subr.bf16.mxu0 %v2518_v30  ;;  %vm3616_vm5 = vcmask 146432  }
 0x1f2   : > { %v571_v50 = vsel %vm3604_vm6, %v3110_v39, %v570_v6  ;;  %580 = vst.msk [vmem:[#allocation3 + $0x58] sm:$0xff] %vm2840_vm4, %v572_v63  ;;  %v600_v25 = vpop.permute.xlu0 %599  ;;  %v698_v60 = vsel %vm691_vm0, %v682_v21, %v697_v35  ;;  %v598_v7 = vpop.permute.xlu1 %597  ;;  %v1563_v22 = vld [vmem:[#allocation3 + $0xf8] sm:$0xff]  ;;  %2313 = vmatpush1.bf16.msra.mxu0 %v2517_v4  ;;  %vm3614_vm0 = vmmov %vm3613_vm15 }
 0x1f3   : > { %v605_v18 = vrot.slane %v600_v25, 4  ;;  %706 = vst.msk [vmem:[#allocation3 + $0xb8] sm:$0xff] %vm2840_vm4, %v698_v60  ;;  %v604_v40 = vrot.slane %v598_v7, 4  ;;  %v2527_v57 = vcombine.low %v1559_v19, %v1563_v22  ;;  %v2528_v2 = vcombine.high %v1559_v19, %v1563_v22  ;;  %vm3617_vm6 = vmmov %vm3616_vm5 }
 0x1f5   : > { %v611_v39 = vsel %vm469_vm3, %v603_v49, %v604_v40  ;;  %v613_v3 = vsel %vm469_vm3, %v604_v40, %v605_v18  ;;  %2351 = vmatprep.subr.bf16.mxu1 %v2528_v2 }
 0x1f6   : > { %v524_v59 = vpop.permute.xlu0 %523  ;;  %v612_v12 = vsel %vm3605_vm7, %v3119_v44, %v611_v39  ;;  %v614_v16 = vsel %vm3606_vm8, %v598_v7, %v613_v3  ;;  %2352 = vmatpush1.bf16.msra.mxu1 %v2527_v57  ;;  %v487_v26 = vpop.permute.xlu1 %486  ;;  %v1551_v1 = vld [vmem:[#allocation3 + $0x98] sm:$0xff]  ;;  %vm3619_vm7 = vcmask 228352  }
 0x1f7   : > { %v528_v45 = vrot.slane %v524_v59, 4  ;;  %622 = vst.msk [vmem:[#allocation3 + $0x78] sm:$0xff] %vm2840_vm4, %v614_v16  ;;  %v491_v34 = vrot.slane %v487_v26, 4  ;;  %v2509_v54 = vcombine.low %v571_v50, %v612_v12  ;;  %v2510_v28 = vcombine.high %v571_v50, %v612_v12  ;;  %vm3620_vm8 = vmmov %vm3619_vm7 }
 0x1f9   : > { %v534_v49 = vsel %vm469_vm3, %v527_v37, %v528_v45  ;;  %v536_v21 = vsel %vm3607_vm9, %v524_v59, %v528_v45  ;;  %v498_v44 = vsel %vm469_vm3, %v490_v24, %v491_v34  ;;  %v500_v38 = vsel %vm3608_vm10, %v487_v26, %v491_v34  ;;  %2314 = vmatprep.subr.bf16.mxu0 %v2510_v28  ;;  %v1543_v52 = vld [vmem:[#allocation3 + $0x58] sm:$0xff] }
 0x1fa   : > { %v535_v53 = vsel %vm3609_vm11, %v3146_v33, %v534_v49  ;;  %544 = vst.msk [vmem:[#allocation3 + $0x38] sm:$0xff] %vm2840_vm4, %v536_v21  ;;  %v1508_v47 = vpop.permute.xlu0 %1507  ;;  %v499_v5 = vsel %vm3610_vm12, %v3137_v17, %v498_v44  ;;  %508 = vst.msk [vmem:[#allocation3 + $0x18] sm:$0xff] %vm2840_vm4, %v500_v38  ;;  %v1506_v37 = vpop.permute.xlu1 %1505  ;;  %v1555_v29 = vld [vmem:[#allocation3 + $0xb8] sm:$0xff]  ;;  %2315 = vmatpush1.bf16.msra.mxu0 %v2509_v54  ;;  %v3615_v59 = vrot.slane %v3196_v11, 4  ;;  %vm3622_vm9 = vcmask 220160  }
 0x1fb   : > { %v1513_v24 = vrot.slane %v1508_v47, 4  ;;  %v1512_v13 = vrot.slane %v1506_v37, 4  ;;  %v2519_v61 = vcombine.low %v1551_v1, %v1555_v29  ;;  %v2520_v36 = vcombine.high %v1551_v1, %v1555_v29  ;;  %vm3623_vm10 = vmmov %vm3622_vm9 }
 0x1fc   : > { %v2501_v58 = vcombine.low %v499_v5, %v535_v53  ;;  %v2502_v33 = vcombine.high %v499_v5, %v535_v53  ;;  %v3618_v47 = vrot.slane %v3205_v23, 4  ;;  %vm3625_vm11 = vcmask 302080  }
 0x1fd   : > { %v1519_v43 = vsel %vm469_vm3, %v1511_v10, %v1512_v13  ;;  %v1521_v15 = vsel %vm469_vm3, %v1512_v13, %v1513_v24  ;;  %2353 = vmatprep.subr.bf16.mxu1 %v2520_v36  ;;  %vm3626_vm12 = vmmov %vm3625_vm11 }
 0x1fe   : > { %v1424_v17 = vpop.permute.xlu0 %1423  ;;  %v1520_v62 = vsel %vm3611_vm13, %v3165_v9, %v1519_v43  ;;  %v1522_v48 = vsel %vm3612_vm14, %v1506_v37, %v1521_v15  ;;  %2354 = vmatpush1.bf16.msra.mxu1 %v2519_v61  ;;  %v1422_v56 = vpop.permute.xlu1 %1421  ;;  %v1547_v4 = vld [vmem:[#allocation3 + $0x78] sm:$0xff]  ;;  %2316 = vmatprep.subr.bf16.mxu0 %v2502_v33  ;;  %vm3628_vm13 = vcmask 236544  }
 0x1ff   : > { %v1429_v30 = vrot.slane %v1424_v17, 4  ;;  %1530 = vst.msk [vmem:[#allocation3 + $0x358] sm:$0xff] %vm2840_vm4, %v1522_v48  ;;  %v1428_v6 = vrot.slane %v1422_v56, 4  ;;  %v2511_v10 = vcombine.low %v1543_v52, %v1547_v4  ;;  %v2512_v63 = vcombine.high %v1543_v52, %v1547_v4  ;;  %2317 = vmatpush1.bf16.msra.mxu0 %v2501_v58  ;;  %vm3629_vm14 = vmmov %vm3628_vm13 }
 0x200   : > { %v2606_v35 = vcombine.high %v1520_v62, %v1520_v62  ;;  %v2605_v50 = vcombine.low %v1520_v62, %v1520_v62  ;;  %v3621_v58 = vrot.slane %v3223_v14, 4 }
 0x201   : > { %v1435_v9 = vsel %vm469_vm3, %v1427_v31, %v1428_v6  ;;  %v1437_v25 = vsel %vm469_vm3, %v1428_v6, %v1429_v30  ;;  %2355 = vmatprep.subr.bf16.mxu1 %v2512_v63  ;;  %v1535_v60 = vld [vmem:[#allocation3 + $0x18] sm:$0xff] }
 0x202   : > { %v1539_v7 = vld [vmem:[#allocation3 + $0x38] sm:$0xff]  ;;  %v1466_v19 = vpop.permute.xlu0 %1465  ;;  %v1436_v22 = vsel %vm3613_vm15, %v3176_v32, %v1435_v9  ;;  %v1438_v18 = vsel %vm3614_vm0, %v1422_v56, %v1437_v25  ;;  %2356 = vmatpush1.bf16.msra.mxu1 %v2511_v10  ;;  %v1464_v40 = vpop.permute.xlu1 %1463  ;;  %2613 = vmatprep.subr.msk.bf16.mxu0 %vm469_vm3, %v2606_v35  ;;  %v2209_v31 = vsel %vm469_vm3, %v2605_v50, 0  ;;  %v3624_v35 = vrot.slane %v3232_v46, 4 }
 0x203   : > { %v2504_v57 = vcombine.high %v1535_v60, %v1539_v7  ;;  %v1471_v2 = vrot.slane %v1466_v19, 4  ;;  %1446 = vst.msk [vmem:[#allocation3 + $0x318] sm:$0xff] %vm2840_vm4, %v1438_v18  ;;  %v1470_v39 = vrot.slane %v1464_v40, 4  ;;  %v2503_v3 = vcombine.low %v1535_v60, %v1539_v7  ;;  %2323 = vmatpush2.bf16.msra.mxu0 %v2209_v31 }
 0x204   : > { %v3627_v18 = vrot.slane %v3251_v42, 4  ;;  %vm3631_vm15 = vcmask 318464  }
 0x205   : > { %2357 = vmatprep.subr.bf16.mxu1 %v2504_v57  ;;  %v1477_v32 = vsel %vm469_vm3, %v3615_v59, %v1470_v39  ;;  %v1479_v12 = vsel %vm469_vm3, %v1470_v39, %v1471_v2  ;;  %vm3632_vm0 = vmmov %vm3631_vm15 }
 0x206   : > { %v1340_v16 = vpop.permute.xlu0 %1339  ;;  %v1478_v26 = vsel %vm3616_vm5, %v3196_v11, %v1477_v32  ;;  %v1480_v45 = vsel %vm3617_vm6, %v1464_v40, %v1479_v12  ;;  %2358 = vmatpush1.bf16.msra.mxu1 %v2503_v3  ;;  %v1338_v34 = vpop.permute.xlu1 %1337  ;;  %v1639_v54 = vld [vmem:[#allocation3 + $0x358] sm:$0xff]  ;;  %vm3634_vm5 = vcmask 310272  }
 0x207   : > { %v1345_v28 = vrot.slane %v1340_v16, 4  ;;  %1488 = vst.msk [vmem:[#allocation3 + $0x338] sm:$0xff] %vm2840_vm4, %v1480_v45  ;;  %v1344_v49 = vrot.slane %v1338_v34, 4  ;;  %v2608_v21 = vcombine.high %v1639_v54, %v1639_v54  ;;  %v2607_v44 = vcombine.low %v1639_v54, %v1639_v54  ;;  %vm3635_vm6 = vmmov %vm3634_vm5 }
 0x208   : > { %v2597_v38 = vcombine.low %v1436_v22, %v1478_v26  ;;  %v2598_v53 = vcombine.high %v1436_v22, %v1478_v26  ;;  %v3630_v54 = vrot.slane %v3260_v8, 4 }
 0x209   : > { %v1351_v5 = vsel %vm469_vm3, %v3618_v47, %v1344_v49  ;;  %v1353_v11 = vsel %vm469_vm3, %v1344_v49, %v1345_v28  ;;  %2615 = vmatprep.subr.msk.bf16.mxu1 %vm469_vm3, %v2608_v21  ;;  %v2215_v37 = vsel %vm469_vm3, %v2607_v44, 0 }
 0x20a   : > { %v1382_v1 = vpop.permute.xlu0 %1381  ;;  %v1352_v29 = vsel %vm3619_vm7, %v3205_v23, %v1351_v5  ;;  %v1354_v24 = vsel %vm3620_vm8, %v1338_v34, %v1353_v11  ;;  %2364 = vmatpush2.bf16.msra.mxu1 %v2215_v37  ;;  %v1380_v13 = vpop.permute.xlu1 %1379  ;;  %2324 = vmatprep.subr.bf16.mxu0 %v2598_v53  ;;  %v1631_v48 = vld [vmem:[#allocation3 + $0x318] sm:$0xff]  ;;  %v3633_v5 = vrot.slane %v3272_v55, 4 }
 0x20b   : > { %v1387_v61 = vrot.slane %v1382_v1, 4  ;;  %1362 = vst.msk [vmem:[#allocation3 + $0x2d8] sm:$0xff] %vm2840_vm4, %v1354_v24  ;;  %v1386_v36 = vrot.slane %v1380_v13, 4  ;;  %2325 = vmatpush2.bf16.msra.mxu0 %v2597_v38 }
 0x20d   : > { %v1393_v33 = vsel %vm469_vm3, %v3621_v58, %v1386_v36  ;;  %v1395_v43 = vsel %vm469_vm3, %v1386_v36, %v1387_v61 }
 0x20e   : > { %v1256_v15 = vpop.permute.xlu0 %1255  ;;  %v1394_v23 = vsel %vm3622_vm9, %v3223_v14, %v1393_v33  ;;  %v1396_v17 = vsel %vm3623_vm10, %v1380_v13, %v1395_v43  ;;  %v1254_v62 = vpop.permute.xlu1 %1253  ;;  %v1635_v56 = vld [vmem:[#allocation3 + $0x338] sm:$0xff] }
 0x20f   : > { %v1261_v52 = vrot.slane %v1256_v15, 4  ;;  %1404 = vst.msk [vmem:[#allocation3 + $0x2f8] sm:$0xff] %vm2840_vm4, %v1396_v17  ;;  %v1260_v4 = vrot.slane %v1254_v62, 4  ;;  %v2599_v30 = vcombine.low %v1631_v48, %v1635_v56  ;;  %v2600_v6 = vcombine.high %v1631_v48, %v1635_v56 }
 0x210   : > { %v2589_v10 = vcombine.low %v1352_v29, %v1394_v23  ;;  %v2590_v63 = vcombine.high %v1352_v29, %v1394_v23 }
 0x211   : > { %v1267_v50 = vsel %vm469_vm3, %v3624_v35, %v1260_v4  ;;  %v1269_v14 = vsel %vm469_vm3, %v1260_v4, %v1261_v52  ;;  %2365 = vmatprep.subr.bf16.mxu1 %v2600_v6 }
 0x212   : > { %v1298_v9 = vpop.permute.xlu0 %1297  ;;  %v1268_v25 = vsel %vm3625_vm11, %v3232_v46, %v1267_v50  ;;  %v1270_v60 = vsel %vm3626_vm12, %v1254_v62, %v1269_v14  ;;  %2366 = vmatpush2.bf16.msra.mxu1 %v2599_v30  ;;  %v1296_v7 = vpop.permute.xlu1 %1295  ;;  %2326 = vmatprep.subr.bf16.mxu0 %v2590_v63  ;;  %v1623_v3 = vld [vmem:[#allocation3 + $0x2d8] sm:$0xff]  ;;  %v3636_v62 = vrot.slane %v3278_v20, 4 }
 0x213   : > { %v1303_v19 = vrot.slane %v1298_v9, 4  ;;  %1278 = vst.msk [vmem:[#allocation3 + $0x298] sm:$0xff] %vm2840_vm4, %v1270_v60  ;;  %v1302_v22 = vrot.slane %v1296_v7, 4  ;;  %2327 = vmatpush2.bf16.msra.mxu0 %v2589_v10 }
 0x215   : > { %v1309_v40 = vsel %vm469_vm3, %v3627_v18, %v1302_v22  ;;  %v1311_v57 = vsel %vm469_vm3, %v1302_v22, %v1303_v19 }
 0x216   : > { %v1172_v2 = vpop.permute.xlu0 %1171  ;;  %v1310_v46 = vsel %vm3628_vm13, %v3251_v42, %v1309_v40  ;;  %v1312_v39 = vsel %vm3629_vm14, %v1296_v7, %v1311_v57  ;;  %v1170_v31 = vpop.permute.xlu1 %1169  ;;  %v1627_v59 = vld [vmem:[#allocation3 + $0x2f8] sm:$0xff] }
 0x217   : > { %v1177_v32 = vrot.slane %v1172_v2, 4  ;;  %1320 = vst.msk [vmem:[#allocation3 + $0x2b8] sm:$0xff] %vm2840_vm4, %v1312_v39  ;;  %v1176_v12 = vrot.slane %v1170_v31, 4  ;;  %v2591_v16 = vcombine.low %v1623_v3, %v1627_v59  ;;  %v2592_v26 = vcombine.high %v1623_v3, %v1627_v59 }
 0x218   : > { %v2581_v45 = vcombine.low %v1268_v25, %v1310_v46  ;;  %v2582_v34 = vcombine.high %v1268_v25, %v1310_v46 }
 0x219   : > { %v1183_v28 = vsel %vm469_vm3, %v3630_v54, %v1176_v12  ;;  %v1185_v42 = vsel %vm469_vm3, %v1176_v12, %v1177_v32  ;;  %2367 = vmatprep.subr.bf16.mxu1 %v2592_v26 }
 0x21a   : > { %v1214_v49 = vpop.permute.xlu0 %1213  ;;  %v1184_v21 = vsel %vm3631_vm15, %v3260_v8, %v1183_v28  ;;  %v1186_v44 = vsel %vm3632_vm0, %v1170_v31, %v1185_v42  ;;  %2368 = vmatpush2.bf16.msra.mxu1 %v2591_v16  ;;  %v1212_v38 = vpop.permute.xlu1 %1211  ;;  %2328 = vmatprep.subr.bf16.mxu0 %v2582_v34  ;;  %v1615_v13 = vld [vmem:[#allocation3 + $0x298] sm:$0xff] }
 0x21b   : > { %v1219_v53 = vrot.slane %v1214_v49, 4  ;;  %1194 = vst.msk [vmem:[#allocation3 + $0x258] sm:$0xff] %vm2840_vm4, %v1186_v44  ;;  %v1218_v47 = vrot.slane %v1212_v38, 4  ;;  %2329 = vmatpush2.bf16.msra.mxu0 %v2581_v45 }
 0x21d   : > { %v1225_v11 = vsel %vm469_vm3, %v3633_v5, %v1218_v47  ;;  %v1227_v37 = vsel %vm469_vm3, %v1218_v47, %v1219_v53 }
 0x21e   : > { %v1132_v1 = vpop.permute.xlu0 %1131  ;;  %v1226_v8 = vsel %vm3634_vm5, %v3272_v55, %v1225_v11  ;;  %v1228_v29 = vsel %vm3635_vm6, %v1212_v38, %v1227_v37  ;;  %v1096_v24 = vpop.permute.xlu1 %1095  ;;  %v1619_v61 = vld [vmem:[#allocation3 + $0x2b8] sm:$0xff] }
 0x21f   : > { %v1136_v36 = vrot.slane %v1132_v1, 4  ;;  %1236 = vst.msk [vmem:[#allocation3 + $0x278] sm:$0xff] %vm2840_vm4, %v1228_v29  ;;  %v1100_v58 = vrot.slane %v1096_v24, 4  ;;  %v2583_v33 = vcombine.low %v1615_v13, %v1619_v61  ;;  %v2584_v43 = vcombine.high %v1615_v13, %v1619_v61 }
 0x220   : > { %v2573_v15 = vcombine.low %v1184_v21, %v1226_v8  ;;  %v2574_v23 = vcombine.high %v1184_v21, %v1226_v8 }
 0x221   : > { %v1142_v17 = vsel %vm469_vm3, %v1135_v51, %v1136_v36  ;;  %v1144_v55 = vsel %vm1138_vm1, %v1132_v1, %v1136_v36  ;;  %v1106_v48 = vsel %vm469_vm3, %v3636_v62, %v1100_v58  ;;  %v1108_v56 = vsel %vm1102_vm2, %v1096_v24, %v1100_v58  ;;  %2369 = vmatprep.subr.bf16.mxu1 %v2584_v43 }
 0x222   : > { %v1143_v52 = vsel %vm1138_vm1, %v3290_v0, %v1142_v17  ;;  %1152 = vst.msk [vmem:[#allocation3 + $0x238] sm:$0xff] %vm2840_vm4, %v1144_v55  ;;  %v1107_v4 = vsel %vm1102_vm2, %v3278_v20, %v1106_v48  ;;  %1116 = vst.msk [vmem:[#allocation3 + $0x218] sm:$0xff] %vm2840_vm4, %v1108_v56  ;;  %2370 = vmatpush2.bf16.msra.mxu1 %v2583_v33  ;;  %2330 = vmatprep.subr.bf16.mxu0 %v2574_v23  ;;  %v1607_v6 = vld [vmem:[#allocation3 + $0x258] sm:$0xff]  ;;  %vm2391_vm3 = vcmask 850944  }
 0x223   : > { %2331 = vmatpush2.bf16.msra.mxu0 %v2573_v15  ;;  %v2565_v51 = vcombine.low %v1107_v4, %v1143_v52  ;;  %v2566_v30 = vcombine.high %v1107_v4, %v1143_v52 }
 0x225   : > { %2332 = vmatprep.subr.bf16.mxu0 %v2566_v30 }
 0x226   : > { %v1611_v10 = vld [vmem:[#allocation3 + $0x278] sm:$0xff] }
 0x227   : > { %v2575_v63 = vcombine.low %v1607_v6, %v1611_v10  ;;  %v2576_v0 = vcombine.high %v1607_v6, %v1611_v10  ;;  %2333 = vmatpush2.bf16.msra.mxu0 %v2565_v51 }
 0x229   : > { %2371 = vmatprep.subr.bf16.mxu1 %v2576_v0  ;;  %v1599_v35 = vld [vmem:[#allocation3 + $0x218] sm:$0xff] }
 0x22a   : > { %v1603_v50 = vld [vmem:[#allocation3 + $0x238] sm:$0xff]  ;;  %2372 = vmatpush2.bf16.msra.mxu1 %v2575_v63  ;;  %2335 = vmatmul.mubr.bf16.vlgmr.msra.gmra.mxu0 %v3302_v41 }
 0x22b   : > { %v2568_v20 = vcombine.high %v1599_v35, %v1603_v50  ;;  %v2567_v27 = vcombine.low %v1599_v35, %v1603_v50  ;;  %v1644_v14 = vpop.permute.xlu1 %1643 }
 0x22d   : > { %2373 = vmatprep.subr.bf16.mxu1 %v2568_v20 }
 0x22e   : > { %2374 = vmatpush2.bf16.msra.mxu1 %v2567_v27 }
 0x231   : > { %2376 = vmatmul.mubr.bf16.vlgmr.msra.gmra.mxu1 %v3302_v41 }
 0x28d   : > { %v2254_v9 = vpop.f32.mrf.mxu0 }
 0x28e   : > { %v2255_v25 = vadd.f32 %v2254_v9, %v1644_v14 }
 0x28f   : > { %v2256_v60 = vpop.f32.mrf.mxu0 }
 0x290   : > { %v2257_v7 = vadd.f32 %v2256_v60, %v1644_v14  ;;  %2384 = vst [vmem:[%s3545_s24] sm:$0xff] %v2255_v25 }
 0x291   : > { %v2295_v19 = vpop.f32.mrf.mxu1  ;;  %v2258_v22 = vpop.f32.mrf.mxu0 }
 0x292   : > { %v2296_v41 = vadd.f32 %v2295_v19, %v1644_v14  ;;  %2385 = vst [vmem:[%s3545_s24 + $0x8] sm:$0xff] %v2257_v7 }
 0x293   : > { %v2297_v18 = vpop.f32.mrf.mxu1  ;;  %v2259_v40 = vpop.f32.mrf.mxu0 }
 0x294   : > { %v2298_v57 = vadd.f32 %v2297_v18, %v1644_v14  ;;  %2386 = vst [vmem:[%s3545_s24 + $0x10] sm:$0xff] %v2296_v41 }
 0x295   : > { %v2299_v2 = vpop.f32.mrf.mxu1 }
 0x296   : > { %2387 = vst [vmem:[%s3545_s24 + $0x18] sm:$0xff] %v2298_v57 }
 0x297   : > { %v2300_v46 = vpop.f32.mrf.mxu1 }
 0x2ea   : > { %v2336_v39 = vpop.f32.mrf.mxu0 }
 0x2eb   : > { %v2337_v31 = vadd.f32 %v2336_v39, %v1644_v14 }
 0x2ec   : > { %v2338_v3 = vpop.f32.mrf.mxu0 }
 0x2ed   : > { %2388 = vst [vmem:[%s3545_s24 + $0x20] sm:$0xff] %v2337_v31  ;;  %v2339_v59 = vadd.f32 %v2338_v3, %v1644_v14 }
 0x2ee   : > { %v2340_v32 = vpop.f32.mrf.mxu0 }
 0x2ef   : > { %2389 = vst [vmem:[%s3545_s24 + $0x28] sm:$0xff] %v2339_v59 }
 0x2f0   : > { %v2341_v12 = vpop.f32.mrf.mxu0 }
 0x2f1   : > { %v2377_v16 = vpop.f32.mrf.mxu1 }
 0x2f2   : > { %v2378_v26 = vadd.f32 %v2377_v16, %v1644_v14 }
 0x2f3   : > { %v2379_v45 = vpop.f32.mrf.mxu1 }
 0x2f4   : > { %2390 = vst [vmem:[%s3545_s24 + $0x30] sm:$0xff] %v2378_v26  ;;  %v2380_v34 = vadd.f32 %v2379_v45, %v1644_v14 }
 0x2f5   : > { %v2381_v54 = vpop.f32.mrf.mxu1 }
 0x2f6   : > { %2392 = vst.msk [vmem:[%s3545_s24 + $0x38] sm:$0xff] %vm2391_vm3, %v2380_v34 }
 0x2f7   : > { %v2382_v28 = vpop.f32.mrf.mxu1 }
 0x2f8 PF: > { %s16_s21 = sadd.s32 1, %s2705_s21  }
 0x2f9   : > { %p13_p4 = scmp.ge.s32.totalorder %s16_s21, 4  }
 0x2fb   :  { %15 = sbr.rel (!%p13_p4) target bundleno = 1 (0x1), region = 80 }

</bundles_post_ra>
